<compile_context>
chip_gen: v6e
topology: v6e:2x2x1
jax: 0.10.0
libtpu: 0.0.40
codegen_flags: <defaults>
</compile_context>

<pallas_src>
import functools
import math

import jax
import jax.numpy as jnp
from jax.experimental import pallas as pl
from jax.experimental.pallas import tpu as pltpu

LN_EPS = 1e-5                    # nn.LayerNorm default
# Safe on every generation at these shapes; keep <= ~48 MiB if tiles grow so it
# still fits v7x's 64 MiB physical VMEM (v5e/v6e have 128 MiB).
VMEM_LIMIT = 32 * 1024 * 1024


def _layernorm(x, gamma, beta):
    # f32 statistics, biased variance (matches nn.LayerNorm)
    mean = jnp.mean(x, axis=-1, keepdims=True)
    var = jnp.mean((x - mean) ** 2, axis=-1, keepdims=True)
    return (x - mean) * jax.lax.rsqrt(var + LN_EPS) * gamma + beta


# ----------------------------------------------------------------------------
# Kernel 1: fused QKV projection.
# Grid: (B, S // TQ).  One (TQ, D) x (D, 3D) bf16 matmul (f32 acc) per step.
# Writes Q/V head-major (H, TQ, dk) and K transposed (H, dk, TQ) directly, so
# kernel 2 needs no layout plumbing and nothing round-trips through XLA.
# ----------------------------------------------------------------------------
def qkv_kernel(x_ref, w_ref, q_ref, k_ref, v_ref, *, n_heads):
    x = x_ref[0]                                                     # (TQ, D) bf16
    qkv = jnp.dot(x, w_ref[...], preferred_element_type=jnp.float32)  # (TQ, 3D) f32
    D = qkv.shape[1] // 3
    dk = D // n_heads
    # per-head slices are static, lane-aligned (dk multiple of 128 in the demo)
    for h in range(n_heads):
        q_h = qkv[:, h * dk:(h + 1) * dk]                 # (TQ, dk), Wq pre-scaled
        k_h = qkv[:, D + h * dk:D + (h + 1) * dk]         # (TQ, dk)
        v_h = qkv[:, 2 * D + h * dk:2 * D + (h + 1) * dk]  # (TQ, dk)
        q_ref[0, h] = q_h.astype(jnp.bfloat16)            # (TQ, dk)
        k_ref[0, h] = k_h.T.astype(jnp.bfloat16)          # (dk, TQ)  K stored K^T
        v_ref[0, h] = v_h.astype(jnp.bfloat16)            # (TQ, dk)


# ----------------------------------------------------------------------------
# Kernel 2: attention (batched over heads) + Wo + residual/LN1 + FFN + residual/LN2
# Grid: (B, S // TQ); q block (1, H, TQ, dk), full K^T/V blocks per batch.
# ----------------------------------------------------------------------------
def block_kernel(x_ref, q_ref, k_ref, v_ref, wo_ref,
                 ln1_g_ref, ln1_b_ref,
                 w1_ref, b1_ref, w2_ref, b2_ref,
                 ln2_g_ref, ln2_b_ref,
                 out_ref, *, causal, q_tile):
    x = x_ref[0]                                   # (TQ, D) f32 (residual stream)
    q = q_ref[0]                                   # (H, TQ, dk) bf16, pre-scaled
    kt = k_ref[0]                                  # (H, dk, S)  bf16 (K transposed)
    v = v_ref[0]                                   # (H, S,  dk) bf16
    TQ, D = x.shape
    H = q.shape[0]
    S = v.shape[1]

    # scores for all heads in one batched MXU contraction (no K transpose needed)
    scores = jnp.einsum('hqd,hds->hqs', q, kt,
                        preferred_element_type=jnp.float32)          # (H, TQ, S)

    if causal:
        # mask == 0 -> -1e9, matching masked_fill semantics
        q_off = pl.program_id(1) * q_tile
        row = jax.lax.broadcasted_iota(jnp.int32, (TQ, S), 0) + q_off
        col = jax.lax.broadcasted_iota(jnp.int32, (TQ, S), 1)
        keep = col <= row
        scores = jnp.where(keep[None, :, :], scores, -1e9)

    # numerically-stable softmax statistics in f32
    m = jnp.max(scores, axis=-1, keepdims=True)
    p = jnp.exp(scores - m)
    denom = jnp.sum(p, axis=-1, keepdims=True)                       # (H, TQ, 1)

    # context for all heads in one batched contraction; normalize the small
    # (H, TQ, dk) context (EUP reciprocal) instead of the (H, TQ, S) weights
    ctx = jnp.einsum('hqs,hsd->hqd', p.astype(jnp.bfloat16), v,
                     preferred_element_type=jnp.float32)             # (H, TQ, dk)
    ctx = ctx * pl.reciprocal(denom, approx=True)

    # concat heads along the lane dim -> one full-width (TQ, D) x (D, D) matmul
    ctx_flat = jnp.concatenate([ctx[h] for h in range(H)],
                               axis=-1).astype(jnp.bfloat16)         # (TQ, D)
    attn = jnp.dot(ctx_flat, wo_ref[...],
                   preferred_element_type=jnp.float32)               # (TQ, D)

    # residual + LayerNorm1 (f32)
    x1 = _layernorm(x + attn, ln1_g_ref[...], ln1_b_ref[...])

    # FeedForward: relu(x1 @ W1 + b1) @ W2 + b2   (bf16 matmuls, f32 acc)
    h1 = jnp.dot(x1.astype(jnp.bfloat16), w1_ref[...],
                 preferred_element_type=jnp.float32) + b1_ref[...]
    h1 = jnp.maximum(h1, 0.0)
    ff = jnp.dot(h1.astype(jnp.bfloat16), w2_ref[...],
                 preferred_element_type=jnp.float32) + b2_ref[...]

    # residual + LayerNorm2 (f32)
    out_ref[0] = _layernorm(x1 + ff, ln2_g_ref[...], ln2_b_ref[...])


# ----------------------------------------------------------------------------
# Wrapper
# ----------------------------------------------------------------------------
def transformer_block(x, p, n_heads, *, causal=True, q_tile=128):
    B, S, D = x.shape
    assert D % n_heads == 0
    dk = D // n_heads
    d_ff = p["w1"].shape[1]
    ts = min(q_tile, S)
    assert S % ts == 0, "sequence length must be divisible by the query tile"
    n_q = S // ts
    scale = 1.0 / math.sqrt(dk)

    cparams = pltpu.CompilerParams(
        dimension_semantics=("parallel", "parallel"),
        vmem_limit_bytes=VMEM_LIMIT)

    # --- fused QKV weight, bf16, 1/sqrt(dk) folded into Wq ----------------------
    w_qkv = jnp.concatenate([p["wq"] * scale, p["wk"], p["wv"]],
                            axis=1).astype(jnp.bfloat16)             # (D, 3D)
    x_bf = x.astype(jnp.bfloat16)                                    # kernel-1 input

    qv_spec = pl.BlockSpec((1, n_heads, ts, dk), lambda b, s: (b, 0, s, 0))
    kT_out_spec = pl.BlockSpec((1, n_heads, dk, ts), lambda b, s: (b, 0, 0, s))

    q, k, v = pl.pallas_call(
        functools.partial(qkv_kernel, n_heads=n_heads),
        out_shape=(jax.ShapeDtypeStruct((B, n_heads, S, dk), jnp.bfloat16),
                   jax.ShapeDtypeStruct((B, n_heads, dk, S), jnp.bfloat16),
                   jax.ShapeDtypeStruct((B, n_heads, S, dk), jnp.bfloat16)),
        grid=(B, n_q),
        in_specs=[pl.BlockSpec((1, ts, D), lambda b, s: (b, s, 0)),       # x (bf16)
                  pl.BlockSpec((D, 3 * D), lambda b, s: (0, 0))],         # Wqkv
        out_specs=(qv_spec, kT_out_spec, qv_spec),
        compiler_params=cparams,
    )(x_bf, w_qkv)

    # --- kernel 2: attention + Wo + LN1 + FFN + LN2 -----------------------------
    wo_b = p["wo"].astype(jnp.bfloat16)
    w1_b = p["w1"].astype(jnp.bfloat16)
    w2_b = p["w2"].astype(jnp.bfloat16)

    act_spec = pl.BlockSpec((1, ts, D), lambda b, s: (b, s, 0))
    vec_d = pl.BlockSpec((1, D), lambda b, s: (0, 0))
    vec_f = pl.BlockSpec((1, d_ff), lambda b, s: (0, 0))

    out = pl.pallas_call(
        functools.partial(block_kernel, causal=causal, q_tile=ts),
        out_shape=jax.ShapeDtypeStruct((B, S, D), jnp.float32),
        grid=(B, n_q),
        in_specs=[
            act_spec,                                                     # x (f32 residual)
            qv_spec,                                                      # q (head-major)
            pl.BlockSpec((1, n_heads, dk, S), lambda b, s: (b, 0, 0, 0)),  # K^T (full per batch)
            pl.BlockSpec((1, n_heads, S, dk), lambda b, s: (b, 0, 0, 0)),  # V   (full per batch)
            pl.BlockSpec((D, D), lambda b, s: (0, 0)),                    # wo
            vec_d, vec_d,                                                 # ln1 g, b
            pl.BlockSpec((D, d_ff), lambda b, s: (0, 0)),                 # w1
            vec_f,                                                        # b1
            pl.BlockSpec((d_ff, D), lambda b, s: (0, 0)),                 # w2
            vec_d,                                                        # b2
            vec_d, vec_d,                                                 # ln2 g, b
        ],
        out_specs=act_spec,
        compiler_params=cparams,
    )(x, q, k, v, wo_b,
      p["ln1_g"], p["ln1_b"],
      w1_b, p["b1"], w2_b, p["b2"],
      p["ln2_g"], p["ln2_b"])
    return out


# ----------------------------------------------------------------------------
# Pure-JAX f32 reference (mirrors the PyTorch module) + parameter init
# ----------------------------------------------------------------------------
def reference_block(x, p, n_heads, *, causal=True):
    B, S, D = x.shape
    dk = D // n_heads

    def split(t):
        return t.reshape(B, S, n_heads, dk).transpose(0, 2, 1, 3)

    q, k, v = split(x @ p["wq"]), split(x @ p["wk"]), split(x @ p["wv"])
    scores = jnp.einsum('bhqd,bhkd->bhqk', q, k) / math.sqrt(dk)
    if causal:
        keep = jnp.tril(jnp.ones((S, S), bool))
        scores = jnp.where(keep[None, None], scores, -1e9)
    w = jax.nn.softmax(scores, axis=-1)
    ctx = jnp.einsum('bhqk,bhkd->bhqd', w, v)
    ctx = ctx.transpose(0, 2, 1, 3).reshape(B, S, D)
    attn = ctx @ p["wo"]
    x1 = _layernorm(x + attn, p["ln1_g"], p["ln1_b"])
    h1 = jax.nn.relu(x1 @ p["w1"] + p["b1"])
    ff = h1 @ p["w2"] + p["b2"]
    return _layernorm(x1 + ff, p["ln2_g"], p["ln2_b"])


def init_block_params(key, d_model, n_heads, d_ff):
    ks = jax.random.split(key, 12)

    def rnd(k, shape, scale=0.02):
        return jax.random.normal(k, shape, jnp.float32) * scale

    return dict(
        wq=rnd(ks[0], (d_model, d_model)),
        wk=rnd(ks[1], (d_model, d_model)),
        wv=rnd(ks[2], (d_model, d_model)),
        wo=rnd(ks[3], (d_model, d_model)),
        ln1_g=1.0 + rnd(ks[4], (1, d_model), 0.1),
        ln1_b=rnd(ks[5], (1, d_model), 0.1),
        w1=rnd(ks[6], (d_model, d_ff)),
        b1=rnd(ks[7], (1, d_ff)),
        w2=rnd(ks[8], (d_ff, d_model)),
        b2=rnd(ks[9], (1, d_model)),
        ln2_g=1.0 + rnd(ks[10], (1, d_model), 0.1),
        ln2_b=rnd(ks[11], (1, d_model), 0.1),
    )


if __name__ == "__main__":
    # small but lane-dense shapes (D, d_ff, d_k multiples of 128; S mult of 8)
    BATCH, SEQ, D_MODEL, N_HEADS, D_FF = 2, 128, 256, 2, 512

    key = jax.random.PRNGKey(0)
    k_x, k_p = jax.random.split(key)
    params = init_block_params(k_p, D_MODEL, N_HEADS, D_FF)
    x = jax.random.normal(k_x, (BATCH, SEQ, D_MODEL), jnp.float32)

    out = transformer_block(x, params, N_HEADS, causal=True, q_tile=128)
    jax.block_until_ready(out)

    assert out.shape == (BATCH, SEQ, D_MODEL)
    assert bool(jnp.all(jnp.isfinite(out)))

    ref = reference_block(x, params, N_HEADS, causal=True)
    max_err = float(jnp.max(jnp.abs(out - ref)))
    assert max_err < 0.1, f"max abs error vs f32 reference: {max_err}"

    print("KERNEL_OK")
</pallas_src>

<mosaic_0001>
module attributes {stable_mosaic.version = 11 : i64} {
  func.func @qkv_kernel(%arg0: i32, %arg1: i32, %arg2: memref<1x128x256xbf16, #tpu.memory_space<vmem>>, %arg3: memref<256x768xbf16, #tpu.memory_space<vmem>>, %arg4: memref<1x2x128x128xbf16, #tpu.memory_space<vmem>>, %arg5: memref<1x2x128x128xbf16, #tpu.memory_space<vmem>>, %arg6: memref<1x2x128x128xbf16, #tpu.memory_space<vmem>>) attributes {dimension_semantics = [#tpu.dimension_semantics<parallel>, #tpu.dimension_semantics<parallel>], iteration_bounds = array<i64: 2, 1>, scalar_prefetch = 0 : i64, scratch_operands = 0 : i64, tpu.core_type = #tpu.core_type<tc>, window_params = [{transform_indices = @transform_0, window_bounds = array<i64: 1, 128, 256>}, {pipeline_mode = #tpu.pipeline_mode<synchronous>, transform_indices = @transform_1, window_bounds = array<i64: 256, 768>}, {transform_indices = @transform_2, window_bounds = array<i64: 1, 2, 128, 128>}, {transform_indices = @transform_3, window_bounds = array<i64: 1, 2, 128, 128>}, {transform_indices = @transform_4, window_bounds = array<i64: 1, 2, 128, 128>}]} {
    %c0 = arith.constant 0 : index
    %c0_0 = arith.constant 0 : index
    %c0_1 = arith.constant 0 : index
    %0 = vector.load %arg2[%c0, %c0_0, %c0_1] : memref<1x128x256xbf16, #tpu.memory_space<vmem>>, vector<1x128x256xbf16>
    %1 = vector.shape_cast %0 : vector<1x128x256xbf16> to vector<128x256xbf16>
    %c0_2 = arith.constant 0 : index
    %c0_3 = arith.constant 0 : index
    %2 = vector.load %arg3[%c0_2, %c0_3] : memref<256x768xbf16, #tpu.memory_space<vmem>>, vector<256x768xbf16>
    %cst = arith.constant dense<0.000000e+00> : vector<128x768xf32>
    %3 = tpu.matmul %1, %2, %cst {dimension_numbers = #tpu.dot_dimension_numbers<[1], [0], [0], [1], [0, 0, 1, 1], [], []>} : vector<128x256xbf16>, vector<256x768xbf16>, vector<128x768xf32> -> vector<128x768xf32>
    %4 = vector.extract_strided_slice %3 {offsets = [0, 0], sizes = [128, 128], strides = [1, 1]} : vector<128x768xf32> to vector<128x128xf32>
    %5 = vector.extract_strided_slice %3 {offsets = [0, 256], sizes = [128, 128], strides = [1, 1]} : vector<128x768xf32> to vector<128x128xf32>
    %6 = vector.extract_strided_slice %3 {offsets = [0, 512], sizes = [128, 128], strides = [1, 1]} : vector<128x768xf32> to vector<128x128xf32>
    %7 = arith.truncf %4 : vector<128x128xf32> to vector<128x128xbf16>
    %c0_4 = arith.constant 0 : index
    %c0_5 = arith.constant 0 : index
    %c0_6 = arith.constant 0 : index
    %c0_7 = arith.constant 0 : index
    %8 = vector.load %arg4[%c0_4, %c0_5, %c0_6, %c0_7] : memref<1x2x128x128xbf16, #tpu.memory_space<vmem>>, vector<1x1x128x128xbf16>
    %9 = vector.shape_cast %8 : vector<1x1x128x128xbf16> to vector<128x128xbf16>
    %10 = vector.shape_cast %7 : vector<128x128xbf16> to vector<1x1x128x128xbf16>
    tpu.vector_store %arg4[%c0_4, %c0_5, %c0_6, %c0_7], %10 {strides = array<i32>} : memref<1x2x128x128xbf16, #tpu.memory_space<vmem>>, vector<1x1x128x128xbf16>,
    %11 = tpu.transpose %5, [1, 0] : vector<128x128xf32> -> vector<128x128xf32>
    %12 = arith.truncf %11 : vector<128x128xf32> to vector<128x128xbf16>
    %c0_8 = arith.constant 0 : index
    %c0_9 = arith.constant 0 : index
    %c0_10 = arith.constant 0 : index
    %c0_11 = arith.constant 0 : index
    %13 = vector.load %arg5[%c0_8, %c0_9, %c0_10, %c0_11] : memref<1x2x128x128xbf16, #tpu.memory_space<vmem>>, vector<1x1x128x128xbf16>
    %14 = vector.shape_cast %13 : vector<1x1x128x128xbf16> to vector<128x128xbf16>
    %15 = vector.shape_cast %12 : vector<128x128xbf16> to vector<1x1x128x128xbf16>
    tpu.vector_store %arg5[%c0_8, %c0_9, %c0_10, %c0_11], %15 {strides = array<i32>} : memref<1x2x128x128xbf16, #tpu.memory_space<vmem>>, vector<1x1x128x128xbf16>,
    %16 = arith.truncf %6 : vector<128x128xf32> to vector<128x128xbf16>
    %c0_12 = arith.constant 0 : index
    %c0_13 = arith.constant 0 : index
    %c0_14 = arith.constant 0 : index
    %c0_15 = arith.constant 0 : index
    %17 = vector.load %arg6[%c0_12, %c0_13, %c0_14, %c0_15] : memref<1x2x128x128xbf16, #tpu.memory_space<vmem>>, vector<1x1x128x128xbf16>
    %18 = vector.shape_cast %17 : vector<1x1x128x128xbf16> to vector<128x128xbf16>
    %19 = vector.shape_cast %16 : vector<128x128xbf16> to vector<1x1x128x128xbf16>
    tpu.vector_store %arg6[%c0_12, %c0_13, %c0_14, %c0_15], %19 {strides = array<i32>} : memref<1x2x128x128xbf16, #tpu.memory_space<vmem>>, vector<1x1x128x128xbf16>,
    %20 = vector.extract_strided_slice %3 {offsets = [0, 128], sizes = [128, 128], strides = [1, 1]} : vector<128x768xf32> to vector<128x128xf32>
    %21 = vector.extract_strided_slice %3 {offsets = [0, 384], sizes = [128, 128], strides = [1, 1]} : vector<128x768xf32> to vector<128x128xf32>
    %22 = vector.extract_strided_slice %3 {offsets = [0, 640], sizes = [128, 128], strides = [1, 1]} : vector<128x768xf32> to vector<128x128xf32>
    %23 = arith.truncf %20 : vector<128x128xf32> to vector<128x128xbf16>
    %c0_16 = arith.constant 0 : index
    %c1 = arith.constant 1 : index
    %c0_17 = arith.constant 0 : index
    %c0_18 = arith.constant 0 : index
    %24 = vector.load %arg4[%c0_16, %c1, %c0_17, %c0_18] : memref<1x2x128x128xbf16, #tpu.memory_space<vmem>>, vector<1x1x128x128xbf16>
    %25 = vector.shape_cast %24 : vector<1x1x128x128xbf16> to vector<128x128xbf16>
    %26 = vector.shape_cast %23 : vector<128x128xbf16> to vector<1x1x128x128xbf16>
    tpu.vector_store %arg4[%c0_16, %c1, %c0_17, %c0_18], %26 {strides = array<i32>} : memref<1x2x128x128xbf16, #tpu.memory_space<vmem>>, vector<1x1x128x128xbf16>,
    %27 = tpu.transpose %21, [1, 0] : vector<128x128xf32> -> vector<128x128xf32>
    %28 = arith.truncf %27 : vector<128x128xf32> to vector<128x128xbf16>
    %c0_19 = arith.constant 0 : index
    %c1_20 = arith.constant 1 : index
    %c0_21 = arith.constant 0 : index
    %c0_22 = arith.constant 0 : index
    %29 = vector.load %arg5[%c0_19, %c1_20, %c0_21, %c0_22] : memref<1x2x128x128xbf16, #tpu.memory_space<vmem>>, vector<1x1x128x128xbf16>
    %30 = vector.shape_cast %29 : vector<1x1x128x128xbf16> to vector<128x128xbf16>
    %31 = vector.shape_cast %28 : vector<128x128xbf16> to vector<1x1x128x128xbf16>
    tpu.vector_store %arg5[%c0_19, %c1_20, %c0_21, %c0_22], %31 {strides = array<i32>} : memref<1x2x128x128xbf16, #tpu.memory_space<vmem>>, vector<1x1x128x128xbf16>,
    %32 = arith.truncf %22 : vector<128x128xf32> to vector<128x128xbf16>
    %c0_23 = arith.constant 0 : index
    %c1_24 = arith.constant 1 : index
    %c0_25 = arith.constant 0 : index
    %c0_26 = arith.constant 0 : index
    %33 = vector.load %arg6[%c0_23, %c1_24, %c0_25, %c0_26] : memref<1x2x128x128xbf16, #tpu.memory_space<vmem>>, vector<1x1x128x128xbf16>
    %34 = vector.shape_cast %33 : vector<1x1x128x128xbf16> to vector<128x128xbf16>
    %35 = vector.shape_cast %32 : vector<128x128xbf16> to vector<1x1x128x128xbf16>
    tpu.vector_store %arg6[%c0_23, %c1_24, %c0_25, %c0_26], %35 {strides = array<i32>} : memref<1x2x128x128xbf16, #tpu.memory_space<vmem>>, vector<1x1x128x128xbf16>,
    return
  }
  func.func @transform_0(%arg0: i32, %arg1: i32) -> (i32, i32, i32) {
    %c0_i32 = arith.constant 0 : i32
    %c0_i32_0 = arith.constant 0 : i32
    return %arg0, %arg1, %c0_i32 : i32, i32, i32
  }
  func.func @transform_1(%arg0: i32, %arg1: i32) -> (i32, i32) {
    %c0_i32 = arith.constant 0 : i32
    %c0_i32_0 = arith.constant 0 : i32
    %c0_i32_1 = arith.constant 0 : i32
    return %c0_i32, %c0_i32_0 : i32, i32
  }
  func.func @transform_2(%arg0: i32, %arg1: i32) -> (i32, i32, i32, i32) {
    %c0_i32 = arith.constant 0 : i32
    %c0_i32_0 = arith.constant 0 : i32
    %c0_i32_1 = arith.constant 0 : i32
    return %arg0, %c0_i32, %arg1, %c0_i32_0 : i32, i32, i32, i32
  }
  func.func @transform_3(%arg0: i32, %arg1: i32) -> (i32, i32, i32, i32) {
    %c0_i32 = arith.constant 0 : i32
    %c0_i32_0 = arith.constant 0 : i32
    %c0_i32_1 = arith.constant 0 : i32
    return %arg0, %c0_i32, %c0_i32_0, %arg1 : i32, i32, i32, i32
  }
  func.func @transform_4(%arg0: i32, %arg1: i32) -> (i32, i32, i32, i32) {
    %c0_i32 = arith.constant 0 : i32
    %c0_i32_0 = arith.constant 0 : i32
    %c0_i32_1 = arith.constant 0 : i32
    return %arg0, %c0_i32, %arg1, %c0_i32_0 : i32, i32, i32, i32
  }
}

</mosaic_0001>

<bundles_post_ra>
// kernel: tpu_custom_call.1
= control target key start
LH: loop header
LB: loop body
LE: loop exit
PB: predicated region body
PF: predicated region fallthrough
CT: control target
= control target key end

     0   :  { %s3832_s0 = inlined_call_operand.hbm [shape: bf16[2,128,256], index: 0, kind: input, shape index: {}]   ;;  %s3833_s1 = inlined_call_operand.hbm [shape: bf16[256,768], index: 1, kind: input, shape index: {}]   ;;  %s3834_s2 = inlined_call_operand.hbm [shape: bf16[2,2,128,128], index: 2, kind: output, shape index: {0}]   ;;  %s3835_s3 = inlined_call_operand.hbm [shape: bf16[2,2,128,128], index: 3, kind: output, shape index: {1}]   ;;  %s3836_s4 = inlined_call_operand.hbm [shape: bf16[2,2,128,128], index: 4, kind: output, shape index: {2}]  }
   0x1   :  { %3839 = sst [smem:[#allocation15_spill]] %s3833_s1 }
   0x2   :  { %10 = vsyncpa [#allocation3], 0 }
   0x3   :  { %12 = vsyncpa [#allocation3 + $0x1], 0 }
   0x4   :  { %13 = vsyncpa [#allocation6], 0 }
   0x5   :  { %14 = vsyncpa [#allocation4], 0 }
   0x6   :  { %16 = vsyncpa [#allocation4 + $0x1], 0 }
   0x7   :  { %17 = vsyncpa [#allocation9], 0 }
   0x8   :  { %19 = vsyncpa [#allocation9 + $0x1], 0  ;;  %s3356_s15 = smov 0   ;;  %s3358_s16 = smov 0  }
   0x9   :  { %s3360_s17 = smov 0   ;;  %s3362_s18 = smov 0  }
   0xa   :  { %s3364_s19 = smov 0   ;;  %s3366_s20 = smov 0  }
   0xb LB: > { %s3387_s21 = sadd.s32 4294967295, %s3318_s20   ;;  %s3837_s22 = sadd.s32 4294967294, %s3318_s20   ;;  %s3318_s20 = sphi %s3366_s20, %s25_s20   ;;  %s3314_s19 = sphi %s3364_s19, %s3858_s19   ;;  %s3310_s18 = sphi %s3362_s18, %s3857_s18   ;;  %s3306_s17 = sphi %s3360_s17, %s3856_s17   ;;  %s3302_s16 = sphi %s3358_s16, %s3855_s16   ;;  %s3298_s15 = sphi %s3356_s15, %s3854_s15  }
   0xc   : > { %p59_p0 = scmp.ne.s32.totalorder %s3302_s16, %s3298_s15  ;;  %p3838_p1 = scmp.eq.s32.totalorder %s3387_s21, 0 }
   0xd   : > { %p112_p3 = scmp.eq.s32.totalorder %s3837_s22, 1  ;;  %p2059_p5 = scmp.ge.s32.totalorder %s3318_s20, 1 }
   0xe   : > { %p3398_p4 = por %p3838_p1, %p59_p0  ;;  %p175_p7 = scmp.lt.s32.totalorder %s3318_s20, 3 }
   0xf   : > { %p3403_p6 = por %p112_p3, %p59_p0  ;;  %s3320_s26 = smov [#allocation5]  }
  0x10   : > { %p3408_p8 = pnand %p2059_p5, %p175_p7  ;;  %s187_s27 = sshll.u32 %s3320_s26, 4  ;;  %s188_s27 = int_to_ptr.vmem [resolvable:$true] %s187_s27 }
  0x11   : > { %s3841_s24 = scalar_select %p3403_p6, 1, 0 }
  0x12   : > { %p2767_p9 = pneg %p3408_p8  ;;  %s37_s29 = sadd.s32 1, %s3314_s19 }
  0x13   : > { %s3135_s30 = scalar_lea.vmem %s188_s27, 12288  ;;  %p3143_p5 = scmp.lt.s32.totalorder %s188_s27, %s188_s27 }
  0x14   : > { %p3417_p11 = pnand %p2767_p9, %p3838_p1  ;;  %p3136_p13 = scmp.ne.s32.totalorder %s188_s27, %s3135_s30 }
  0x15   : > { %p3144_p7 = scmp.lt.s32.totalorder %s3135_s30, %s3135_s30 }
  0x16   : > { %p3126_p12 = pneg %p3417_p11 }
  0x17   : > { %p3145_p2 = por %p3144_p7, %p3143_p5 }
  0x18   : > { %p3138_p0 = pnand %p3136_p13, %p3126_p12 }
  0x1a   : > { %p3139_p3 = pneg %p3138_p0 }
  0x1c   : > { %p3146_p6 = pnand %p3145_p2, %p3139_p3 }
  0x1e   : > { %3149 = shalt.err (!%p3146_p6)
}
  0x1f   : > { %s3321_s5 = smov 384   ;;  %s3322_s6 = smov 24  }
  0x20   : > { %s3844_s1 = sld [smem:[#allocation15_spill]]  ;;  %p39_p2 = scmp.ge.s32.totalorder %s37_s29, 2 }
  0x21   : > { %s46_s9 = sadd.s32 1, %s3306_s17  ;;  %p53_p6 = scmp.ne.s32.totalorder %s3306_s17, %s3302_s16 }
  0x22   : > { %p54_p9 = scmp.eq.s32.totalorder %s3318_s20, 0  ;;  %s3860_s29 = smov (%p39_p2, %s37_s29), 0 }
  0x23   : > { %p3846_p13 = scmp.eq.s32.totalorder %s3387_s21, 1  ;;  %s41_s12 = ssub.s32 %s3314_s19, %s3860_s29 }
  0x24   : > { %p3435_p12 = por %p54_p9, %p53_p6  ;;  %p2786_p3 = scmp.lt.s32.totalorder %s3318_s20, 2 }
  0x25   : > { %p3441_p0 = por %p3846_p13, %p53_p6  ;;  %s201_s13 = sand.u32 1, %s3306_s17  }
  0x26   : > { %2770 = dma.hbm_to_vmem [thread:$0]  (!%p3417_p11), %s3844_s1, 12288, %s188_s27, [#allocation6], %s3321_s5, %s3321_s5, %s3322_s6  }
  0x27   : > { %p44_p11 = scmp.eq.s32.totalorder %s41_s12, 0  ;;  %s2062_s14 = sshll.u32 %s201_s13, 7 }
  0x28   : > { %s2338_s27 = sshll.u32 %s3314_s19, 11  ;;  %s205_s6 = scalar_lea.vmem [#allocation2], %s2062_s14 }
  0x29   : > { %s3450_s26 = scalar_select %p44_p11, %s3306_s17, %s46_s9  }
  0x2a   : > { %s214_s5 = scalar_lea.hbm %s3832_s0, %s2338_s27  ;;  %s215_s7 = sshll.u32 %s205_s6, 4  ;;  %s216_s7 = int_to_ptr.vmem [resolvable:$true] %s215_s7 }
  0x2b   : > { %p3458_p5 = pnand %p2786_p3, %p3435_p12  ;;  %s202_s22 = scalar_lea.sflag [#allocation3], %s201_s13 }
  0x2c   : > { %s3163_s12 = scalar_lea.vmem %s216_s7, 2048  ;;  %s3323_s9 = smov [#allocation2]  }
  0x2d   : > { %p3152_p7 = pneg %p3458_p5  ;;  %p3164_p2 = scmp.ne.s32.totalorder %s216_s7, %s3163_s12 }
  0x2e   : > { %s3168_s1 = sshll.u32 %s3323_s9, 4  ;;  %s3169_s1 = int_to_ptr.vmem [resolvable:$false] %s3168_s1 }
  0x2f   : > { %p3166_p6 = pnand %p3164_p2, %p3152_p7  ;;  %s3170_s27 = scalar_lea.vmem %s3169_s1, 4096 }
  0x30   : > { %p3171_p13 = scmp.lt.s32.totalorder %s216_s7, %s3169_s1  ;;  %p3172_p11 = scmp.lt.s32.totalorder %s3170_s27, %s3163_s12 }
  0x31   : > { %p3167_p9 = pneg %p3166_p6 }
  0x32   : > { %p3173_p10 = por %p3172_p11, %p3171_p13 }
  0x34   : > { %p3174_p1 = pnand %p3173_p10, %p3167_p9 }
  0x36   : > { %3177 = shalt.err (!%p3174_p1)
}
  0x37   : > { %s3324_s10 = smov 128   ;;  %s3325_s14 = smov 8  }
  0x38   : > { %2774 = dma.hbm_to_vmem [thread:$0]  (!%p3458_p5), %s214_s5, 2048, %s216_s7, %s202_s22, %s3324_s10, %s3324_s10, %s3325_s14  }
  0x39   : > { %227 = sbr.rel (%p3408_p8) target bundleno = 551 (0x227), region = 28  ;;  %s3469_s13 = sand.u32 (!%p3408_p8), 1, %s3302_s16  }
  0x3a   : > { %s3472_s28 = sshll.u32 (!%p3408_p8), %s3469_s13, 7  ;;  %s230_s1 = scalar_lea.sflag (!%p3408_p8), [#allocation3], %s3469_s13 }
  0x3b   : > { %s3476_s30 = scalar_lea.vmem (!%p3408_p8), [#allocation2], %s3472_s28 }
  0x3e   : > { %3281 = dma.done.wait (%p3398_p4), %s230_s1, 2048  }
  0x3f   : > { %3283 = vsyncadd (%p3398_p4), %s230_s1, 4294965248  ;;  %p3849_p1 = scmp.eq.s32.totalorder %s3387_s21, 0 }
  0x41   : > { %3285 = dma.done.wait (%p3849_p1), [#allocation6], 12288   ;;  %p3850_p8 = pmov %p3849_p1 }
  0x42   : > { %v2956_v0 = vld [vmem:[#allocation5 + $0x15c] ss:$24 sps:$4 sm:$0xff]   ;;  %v2958_v1 = vld [vmem:[#allocation5 + $0x158] ss:$24 sps:$4 sm:$0xff]   ;;  %v2959_v2 = vld [vmem:[#allocation5 + $0x12c] ss:$24 sps:$4 sm:$0xff]  }
  0x43   : > { %3287 = vsyncadd (%p3850_p8), [#allocation6], 4294955008  ;;  %1060 = vmatprep.subr.bf16.mxu1 %v2956_v0  ;;  %v2961_v3 = vld [vmem:[#allocation5 + $0x128] ss:$24 sps:$4 sm:$0xff]   ;;  %v2962_v4 = vld [vmem:[#allocation5 + $0xfc] ss:$24 sps:$4 sm:$0xff]  }
  0x44   : > { %1061 = vmatpush1.bf16.msra.mxu1 %v2958_v1  ;;  %v2964_v5 = vld [vmem:[#allocation5 + $0xf8] ss:$24 sps:$4 sm:$0xff]   ;;  %v2965_v6 = vld [vmem:[#allocation5 + $0xcc] ss:$24 sps:$4 sm:$0xff]   ;;  %v2967_v7 = vld [vmem:[#allocation5 + $0xc8] ss:$24 sps:$4 sm:$0xff]  }
  0x45   : > { %1062 = vmatprep.subr.bf16.mxu1 %v2959_v2  ;;  %v2968_v8 = vld [vmem:[#allocation5 + $0x9c] ss:$24 sps:$4 sm:$0xff]   ;;  %v2970_v9 = vld [vmem:[#allocation5 + $0x98] ss:$24 sps:$4 sm:$0xff]   ;;  %v2971_v10 = vld [vmem:[#allocation5 + $0x6c] ss:$24 sps:$4 sm:$0xff]  }
  0x46   : > { %v2973_v11 = vld [vmem:[#allocation5 + $0x68] ss:$24 sps:$4 sm:$0xff]   ;;  %v2974_v12 = vld [vmem:[#allocation5 + $0x3c] ss:$24 sps:$4 sm:$0xff]   ;;  %v3487_v13 = vld [vmem:[%s3476_s30 + $0x4] ss:$8 sps:$4 sm:$0xff]  }
  0x47   : > { %v2976_v14 = vld [vmem:[#allocation5 + $0x38] ss:$24 sps:$4 sm:$0xff]   ;;  %v2977_v15 = vld [vmem:[#allocation5 + $0xc] ss:$24 sps:$4 sm:$0xff]   ;;  %1092 = vmatprep.mubr.bf16.mxu1 %v3487_v13  ;;  %979 = vmatprep.mubr.bf16.mxu0 %v3487_v13  ;;  %v2979_v16 = vld [vmem:[#allocation5 + $0x8] ss:$24 sps:$4 sm:$0xff]  }
  0x48   : > { %1063 = vmatpush1.bf16.msra.mxu1 %v2961_v3  ;;  %v3016_v17 = vld [vmem:[#allocation5 + $0x154] ss:$24 sps:$4 sm:$0xff]   ;;  %v3018_v18 = vld [vmem:[#allocation5 + $0x150] ss:$24 sps:$4 sm:$0xff]   ;;  %v3021_v20 = vld [vmem:[#allocation5 + $0x124] ss:$24 sps:$4 sm:$0xff]  }
  0x49   : > { %1064 = vmatprep.subr.bf16.mxu1 %v2962_v4  ;;  %v2980_v19 = vld [vmem:[#allocation5 + $0x2dc] ss:$24 sps:$4 sm:$0xff]   ;;  %947 = vmatprep.subr.bf16.mxu0 %v3016_v17  ;;  %v3024_v21 = vld [vmem:[#allocation5 + $0x120] ss:$24 sps:$4 sm:$0xff]   ;;  %v2983_v24 = vld [vmem:[#allocation5 + $0x2ac] ss:$24 sps:$4 sm:$0xff]  }
  0x4a   : > { %948 = vmatpush1.bf16.msra.mxu0 %v3018_v18  ;;  %v2982_v22 = vld [vmem:[#allocation5 + $0x2d8] ss:$24 sps:$4 sm:$0xff]   ;;  %v3025_v23 = vld [vmem:[#allocation5 + $0xf4] ss:$24 sps:$4 sm:$0xff]   ;;  %v2985_v26 = vld [vmem:[#allocation5 + $0x2a8] ss:$24 sps:$4 sm:$0xff]  }
  0x4b   : > { %949 = vmatprep.subr.bf16.mxu0 %v3021_v20  ;;  %v3027_v25 = vld [vmem:[#allocation5 + $0xf0] ss:$24 sps:$4 sm:$0xff]   ;;  %v3030_v27 = vld [vmem:[#allocation5 + $0xc4] ss:$24 sps:$4 sm:$0xff]   ;;  %v3033_v29 = vld [vmem:[#allocation5 + $0xc0] ss:$24 sps:$4 sm:$0xff]  }
  0x4c   : > { %1065 = vmatpush1.bf16.msra.mxu1 %v2964_v5  ;;  %v2986_v28 = vld [vmem:[#allocation5 + $0x27c] ss:$24 sps:$4 sm:$0xff]   ;;  %v2988_v30 = vld [vmem:[#allocation5 + $0x278] ss:$24 sps:$4 sm:$0xff]   ;;  %v2989_v32 = vld [vmem:[#allocation5 + $0x24c] ss:$24 sps:$4 sm:$0xff]  }
  0x4d   : > { %1066 = vmatprep.subr.bf16.mxu1 %v2965_v6  ;;  %v3034_v31 = vld [vmem:[#allocation5 + $0x94] ss:$24 sps:$4 sm:$0xff]   ;;  %v3036_v33 = vld [vmem:[#allocation5 + $0x90] ss:$24 sps:$4 sm:$0xff]   ;;  %v3039_v35 = vld [vmem:[#allocation5 + $0x64] ss:$24 sps:$4 sm:$0xff]  }
  0x4e   : > { %950 = vmatpush1.bf16.msra.mxu0 %v3024_v21  ;;  %v2991_v34 = vld [vmem:[#allocation5 + $0x248] ss:$24 sps:$4 sm:$0xff]   ;;  %v2992_v36 = vld [vmem:[#allocation5 + $0x21c] ss:$24 sps:$4 sm:$0xff]   ;;  %v2994_v38 = vld [vmem:[#allocation5 + $0x218] ss:$24 sps:$4 sm:$0xff]  }
  0x4f   : > { %951 = vmatprep.subr.bf16.mxu0 %v3025_v23  ;;  %v3042_v37 = vld [vmem:[#allocation5 + $0x60] ss:$24 sps:$4 sm:$0xff]   ;;  %v3043_v39 = vld [vmem:[#allocation5 + $0x34] ss:$24 sps:$4 sm:$0xff]   ;;  %v3045_v41 = vld [vmem:[#allocation5 + $0x30] ss:$24 sps:$4 sm:$0xff]  }
  0x50   : > { %1067 = vmatpush1.bf16.msra.mxu1 %v2967_v7  ;;  %v2995_v40 = vld [vmem:[#allocation5 + $0x1ec] ss:$24 sps:$4 sm:$0xff]   ;;  %v2997_v42 = vld [vmem:[#allocation5 + $0x1e8] ss:$24 sps:$4 sm:$0xff]   ;;  %v2998_v44 = vld [vmem:[#allocation5 + $0x1bc] ss:$24 sps:$4 sm:$0xff]  }
  0x51   : > { %1068 = vmatprep.subr.bf16.mxu1 %v2968_v8  ;;  %v3048_v43 = vld [vmem:[#allocation5 + $0x4] ss:$24 sps:$4 sm:$0xff]   ;;  %v3051_v45 = vld [vmem:[#allocation5] ss:$24 sps:$4 sm:$0xff]   ;;  %v3052_v47 = vld [vmem:[#allocation5 + $0x2d4] ss:$24 sps:$4 sm:$0xff]  }
  0x52   : > { %952 = vmatpush1.bf16.msra.mxu0 %v3027_v25  ;;  %v3000_v46 = vld [vmem:[#allocation5 + $0x1b8] ss:$24 sps:$4 sm:$0xff]   ;;  %v3001_v48 = vld [vmem:[#allocation5 + $0x18c] ss:$24 sps:$4 sm:$0xff]   ;;  %v3003_v50 = vld [vmem:[#allocation5 + $0x188] ss:$24 sps:$4 sm:$0xff]  }
  0x53   : > { %953 = vmatprep.subr.bf16.mxu0 %v3030_v27  ;;  %v3054_v49 = vld [vmem:[#allocation5 + $0x2d0] ss:$24 sps:$4 sm:$0xff]   ;;  %v3055_v51 = vld [vmem:[#allocation5 + $0x2a4] ss:$24 sps:$4 sm:$0xff]   ;;  %v3057_v54 = vld [vmem:[#allocation5 + $0x2a0] ss:$24 sps:$4 sm:$0xff]  }
  0x54   : > { %1069 = vmatpush1.bf16.msra.mxu1 %v2970_v9  ;;  %v3491_v52 = vld [vmem:[#allocation5 + $0x164] ss:$24 sps:$4 sm:$0xff]   ;;  %v3494_v53 = vld [vmem:[%s3476_s30] ss:$8 sps:$4 sm:$0xff]   ;;  %v3058_v56 = vld [vmem:[#allocation5 + $0x274] ss:$24 sps:$4 sm:$0xff]  }
  0x55   : > { %1070 = vmatprep.subr.bf16.mxu1 %v2971_v10  ;;  %v3497_v55 = vld [vmem:[%s3476_s30 + $0x14] ss:$8 sps:$4 sm:$0xff]   ;;  %v3499_v57 = vld [vmem:[#allocation5 + $0x160] ss:$24 sps:$4 sm:$0xff]   ;;  %v3060_v59 = vld [vmem:[#allocation5 + $0x270] ss:$24 sps:$4 sm:$0xff]  }
  0x56   : > { %954 = vmatpush1.bf16.msra.mxu0 %v3033_v29  ;;  %v3502_v58 = vld [vmem:[#allocation5 + $0x134] ss:$24 sps:$4 sm:$0xff]   ;;  %v3061_v60 = vld [vmem:[#allocation5 + $0x244] ss:$24 sps:$4 sm:$0xff]   ;;  %v3507_v61 = vld [vmem:[#allocation5 + $0x130] ss:$24 sps:$4 sm:$0xff]  }
  0x57   : > { %955 = vmatprep.subr.bf16.mxu0 %v3034_v31  ;;  %v3510_v62 = vld [vmem:[#allocation5 + $0x104] ss:$24 sps:$4 sm:$0xff]   ;;  %v3513_v63 = vld [vmem:[%s3476_s30 + $0x10] ss:$8 sps:$4 sm:$0xff]   ;;  %v3064_v2 = vld [vmem:[#allocation5 + $0x214] ss:$24 sps:$4 sm:$0xff]  }
  0x58   : > { %1071 = vmatpush1.bf16.msra.mxu1 %v2973_v11  ;;  %v3063_v0 = vld [vmem:[#allocation5 + $0x240] ss:$24 sps:$4 sm:$0xff]   ;;  %v3516_v1 = vld [vmem:[%s3476_s30 + $0x24] ss:$8 sps:$4 sm:$0xff]   ;;  %v3066_v5 = vld [vmem:[#allocation5 + $0x210] ss:$24 sps:$4 sm:$0xff]  }
  0x59   : > { %1072 = vmatprep.subr.bf16.mxu1 %v2974_v12  ;;  %v3519_v3 = vld [vmem:[#allocation5 + $0x100] ss:$24 sps:$4 sm:$0xff]   ;;  %v3522_v4 = vld [vmem:[#allocation5 + $0xd4] ss:$24 sps:$4 sm:$0xff]   ;;  %v3067_v6 = vld [vmem:[#allocation5 + $0x1e4] ss:$24 sps:$4 sm:$0xff]  }
  0x5a   : > { %956 = vmatpush1.bf16.msra.mxu0 %v3036_v33  ;;  %v3527_v7 = vld [vmem:[#allocation5 + $0xd0] ss:$24 sps:$4 sm:$0xff]   ;;  %v3530_v8 = vld [vmem:[#allocation5 + $0xa4] ss:$24 sps:$4 sm:$0xff]   ;;  %v3069_v10 = vld [vmem:[#allocation5 + $0x1e0] ss:$24 sps:$4 sm:$0xff]  }
  0x5b   : > { %957 = vmatprep.subr.bf16.mxu0 %v3039_v35  ;;  %v3533_v9 = vld [vmem:[%s3476_s30 + $0x20] ss:$8 sps:$4 sm:$0xff]   ;;  %v3536_v11 = vld [vmem:[%s3476_s30 + $0x34] ss:$8 sps:$4 sm:$0xff]   ;;  %v3553_v20 = vld [vmem:[%s3476_s30 + $0x30] ss:$8 sps:$4 sm:$0xff]  }
  0x5c   : > { %1073 = vmatpush1.bf16.msra.mxu1 %v2976_v14  ;;  %v3070_v12 = vld [vmem:[#allocation5 + $0x1b4] ss:$24 sps:$4 sm:$0xff]   ;;  %v3539_v14 = vld [vmem:[#allocation5 + $0xa0] ss:$24 sps:$4 sm:$0xff]   ;;  %v3073_v17 = vld [vmem:[#allocation5 + $0x184] ss:$24 sps:$4 sm:$0xff]  }
  0x5d   : > { %1074 = vmatprep.subr.bf16.mxu1 %v2977_v15  ;;  %v3542_v15 = vld [vmem:[#allocation5 + $0x74] ss:$24 sps:$4 sm:$0xff]   ;;  %v3547_v18 = vld [vmem:[#allocation5 + $0x70] ss:$24 sps:$4 sm:$0xff]   ;;  %v3075_v21 = vld [vmem:[#allocation5 + $0x180] ss:$24 sps:$4 sm:$0xff]  }
  0x5e   : > { %958 = vmatpush1.bf16.msra.mxu0 %v3042_v37  ;;  %v3559_v23 = vld [vmem:[#allocation5 + $0x40] ss:$24 sps:$4 sm:$0xff]   ;;  %v3568_v25 = vld [vmem:[#allocation5 + $0x10] ss:$24 sps:$4 sm:$0xff]   ;;  %s3644_s22 = scalar_lea.vmem [#allocation7], %s3472_s28  ;;  %s3657_s23 = scalar_lea.vmem [#allocation10], %s3472_s28 }
  0x5f   : > { %959 = vmatprep.subr.bf16.mxu0 %v3043_v39  ;;  %v3575_v27 = vld [vmem:[%s3476_s30 + $0x40] ss:$8 sps:$4 sm:$0xff]   ;;  %v3597_v33 = vld [vmem:[%s3476_s30 + $0x50] ss:$8 sps:$4 sm:$0xff]   ;;  %s3668_s25 = sshll.u32 %s3310_s18, 11  ;;  %s1859_s5 = sshll.u32 %s3644_s22, 4  ;;  %s3680_s5 = int_to_ptr.vmem [resolvable:$true] %s1859_s5 }
  0x60   : > { %1075 = vmatpush1.bf16.msra.mxu1 %v2979_v16  ;;  %v3072_v16 = vld [vmem:[#allocation5 + $0x1b0] ss:$24 sps:$4 sm:$0xff]   ;;  %v3584_v29 = vld [vmem:[#allocation5 + $0x2e0] ss:$24 sps:$4 sm:$0xff]   ;;  %s3678_s8 = scalar_lea.hbm %s3834_s2, %s3668_s25  ;;  %s1834_s18 = scalar_lea.sflag [#allocation4], %s3469_s13 }
  0x61   : > { %1076 = vmatprep.subr.bf16.mxu1 %v2980_v19  ;;  %v3550_v19 = vld [vmem:[#allocation5 + $0x44] ss:$24 sps:$4 sm:$0xff]   ;;  %v3103_v31 = vld [vmem:[#allocation5 + $0x2b0] ss:$24 sps:$4 sm:$0xff]   ;;  %v3106_v35 = vld [vmem:[#allocation5 + $0x280] ss:$24 sps:$4 sm:$0xff]  }
  0x62   : > { %960 = vmatpush1.bf16.msra.mxu0 %v3045_v41  ;;  %v3109_v37 = vld [vmem:[#allocation5 + $0x250] ss:$24 sps:$4 sm:$0xff]   ;;  %v3112_v41 = vld [vmem:[#allocation5 + $0x220] ss:$24 sps:$4 sm:$0xff]   ;;  %s3178_s12 = scalar_lea.vmem %s3680_s5, 2048  ;;  %s3326_s9 = smov [#allocation7]  }
  0x63   : > { %961 = vmatprep.subr.bf16.mxu0 %v3048_v43  ;;  %v3041_v39 = vld [vmem:[%s3476_s30 + $0x60] ss:$8 sps:$4 sm:$0xff]   ;;  %p3179_p4 = scmp.ne.s32.totalorder %s3680_s5, %s3178_s12  ;;  %s3182_s27 = sshll.u32 %s3326_s9, 4  ;;  %s3183_s27 = int_to_ptr.vmem [resolvable:$false] %s3182_s27 }
  0x64   : > { %1077 = vmatpush2.bf16.msra.mxu1 %v2982_v22  ;;  %v3556_v22 = vld [vmem:[%s3476_s30 + $0x44] ss:$8 sps:$4 sm:$0xff]   ;;  %v3115_v43 = vld [vmem:[#allocation5 + $0x1f0] ss:$24 sps:$4 sm:$0xff]   ;;  %s3184_s10 = scalar_lea.vmem %s3183_s27, 4096  ;;  %p3185_p3 = scmp.lt.s32.totalorder %s3680_s5, %s3183_s27 }
  0x65   : > { %1078 = vmatprep.subr.bf16.mxu1 %v2983_v24  ;;  %v3562_v24 = vld [vmem:[#allocation5 + $0x14] ss:$24 sps:$4 sm:$0xff]   ;;  %p3180_p10 = pnand %p3179_p4, %p3441_p0  ;;  %p3186_p5 = scmp.lt.s32.totalorder %s3184_s10, %s3178_s12 }
  0x66   : > { %962 = vmatpush1.bf16.msra.mxu0 %v3051_v45  ;;  %v3050_v45 = vld [vmem:[%s3476_s30 + $0x70] ss:$8 sps:$4 sm:$0xff]  }
  0x67   : > { %963 = vmatprep.subr.bf16.mxu0 %v3052_v47  ;;  %v3123_v47 = vld [vmem:[#allocation5 + $0x194] ss:$24 sps:$4 sm:$0xff]   ;;  %p3181_p12 = pneg %p3180_p10  ;;  %p3187_p7 = por %p3186_p5, %p3185_p3 }
  0x68   : > { %1079 = vmatpush2.bf16.msra.mxu1 %v2985_v26  ;;  %v3572_v26 = vld [vmem:[#allocation5 + $0x2e4] ss:$24 sps:$4 sm:$0xff]  }
  0x69   : > { %1080 = vmatprep.subr.bf16.mxu1 %v2986_v28  ;;  %v3580_v28 = vld [vmem:[%s3476_s30 + $0x54] ss:$8 sps:$4 sm:$0xff]   ;;  %p3188_p2 = pnand %p3187_p7, %p3181_p12 }
  0x6a   : > { %964 = vmatpush2.bf16.msra.mxu0 %v3054_v49 }
  0x6b   : > { %965 = vmatprep.subr.bf16.mxu0 %v3055_v51 }
  0x6c   : > { %1081 = vmatpush2.bf16.msra.mxu1 %v2988_v30  ;;  %v3587_v30 = vld [vmem:[#allocation5 + $0x2b4] ss:$24 sps:$4 sm:$0xff]  }
  0x6d   : > { %1082 = vmatprep.subr.bf16.mxu1 %v2989_v32  ;;  %v3108_v32 = vld [vmem:[#allocation5 + $0x284] ss:$24 sps:$4 sm:$0xff]  }
  0x6e   : > { %966 = vmatpush2.bf16.msra.mxu0 %v3057_v54 }
  0x6f   : > { %967 = vmatprep.subr.bf16.mxu0 %v3058_v56 }
  0x70   : > { %1083 = vmatpush2.bf16.msra.mxu1 %v2991_v34  ;;  %v3602_v34 = vld [vmem:[%s3476_s30 + $0x64] ss:$8 sps:$4 sm:$0xff]  }
  0x71   : > { %1084 = vmatprep.subr.bf16.mxu1 %v2992_v36  ;;  %v3111_v36 = vld [vmem:[#allocation5 + $0x254] ss:$24 sps:$4 sm:$0xff]  }
  0x72   : > { %968 = vmatpush2.bf16.msra.mxu0 %v3060_v59 }
  0x73   : > { %969 = vmatprep.subr.bf16.mxu0 %v3061_v60 }
  0x74   : > { %1085 = vmatpush2.bf16.msra.mxu1 %v2994_v38  ;;  %v3114_v38 = vld [vmem:[#allocation5 + $0x224] ss:$24 sps:$4 sm:$0xff]  }
  0x75   : > { %1086 = vmatprep.subr.bf16.mxu1 %v2995_v40  ;;  %v3046_v40 = vld [vmem:[%s3476_s30 + $0x74] ss:$8 sps:$4 sm:$0xff]  }
  0x76   : > { %970 = vmatpush2.bf16.msra.mxu0 %v3063_v0 }
  0x77   : > { %971 = vmatprep.subr.bf16.mxu0 %v3064_v2 }
  0x78   : > { %1087 = vmatpush2.bf16.msra.mxu1 %v2997_v42  ;;  %v3117_v42 = vld [vmem:[#allocation5 + $0x1f4] ss:$24 sps:$4 sm:$0xff]  }
  0x79   : > { %1088 = vmatprep.subr.bf16.mxu1 %v2998_v44  ;;  %v3120_v44 = vld [vmem:[#allocation5 + $0x1c4] ss:$24 sps:$4 sm:$0xff]  }
  0x7a   : > { %972 = vmatpush2.bf16.msra.mxu0 %v3066_v5 }
  0x7b   : > { %973 = vmatprep.subr.bf16.mxu0 %v3067_v6 }
  0x7c   : > { %1089 = vmatpush2.bf16.msra.mxu1 %v3000_v46  ;;  %v3118_v46 = vld [vmem:[#allocation5 + $0x1c0] ss:$24 sps:$4 sm:$0xff]  }
  0x7d   : > { %1090 = vmatprep.subr.bf16.mxu1 %v3001_v48  ;;  %v3121_v48 = vld [vmem:[#allocation5 + $0x190] ss:$24 sps:$4 sm:$0xff]  }
  0x7e   : > { %974 = vmatpush2.bf16.msra.mxu0 %v3069_v10 }
  0x7f   : > { %975 = vmatprep.subr.bf16.mxu0 %v3070_v12 }
  0x80   : > { %1091 = vmatpush2.bf16.msra.mxu1 %v3003_v50 }
  0x81   : > { %2723 = vmatprep.subr.bf16.mxu1 %v3491_v52 }
  0x82   : > { %976 = vmatpush2.bf16.msra.mxu0 %v3072_v16 }
  0x83   : > { %1093 = vmatmul.mubr.bf16.vlgmr.msra.gmra.mxu1 %v3494_v53  ;;  %977 = vmatprep.subr.bf16.mxu0 %v3073_v17 }
  0x84   : > { %1102 = vmatprep.mubr.bf16.mxu1 %v3497_v55  ;;  %2739 = vmatpush1.bf16.msra.mxu1 %v3499_v57 }
  0x85   : > { %2724 = vmatprep.subr.bf16.mxu1 %v3502_v58 }
  0x86   : > { %978 = vmatpush2.bf16.msra.mxu0 %v3075_v21 }
  0x87   : > { %1173 = vmatprep.subr.bf16.mxu0 %v3491_v52 }
  0x88   : > { %2740 = vmatpush1.bf16.msra.mxu1 %v3507_v61 }
  0x89   : > { %2725 = vmatprep.subr.bf16.mxu1 %v3510_v62  ;;  %980 = vmatmul.mubr.bf16.vlgmr.msra.gmra.mxu0 %v3494_v53 }
  0x8a   : > { %1174 = vmatpush1.bf16.msra.mxu0 %v3499_v57  ;;  %989 = vmatprep.mubr.bf16.mxu0 %v3497_v55 }
  0x8b   : > { %1103 = vmatmul.mubr.bf16.gmra.mxu1 %v3513_v63  ;;  %1175 = vmatprep.subr.bf16.mxu0 %v3502_v58 }
  0x8c   : > { %1112 = vmatprep.mubr.bf16.mxu1 %v3516_v1  ;;  %2741 = vmatpush1.bf16.msra.mxu1 %v3519_v3 }
  0x8d   : > { %2726 = vmatprep.subr.bf16.mxu1 %v3522_v4 }
  0x8e   : > { %1176 = vmatpush1.bf16.msra.mxu0 %v3507_v61 }
  0x8f   : > { %1177 = vmatprep.subr.bf16.mxu0 %v3510_v62 }
  0x90   : > { %2742 = vmatpush1.bf16.msra.mxu1 %v3527_v7 }
  0x91   : > { %2727 = vmatprep.subr.bf16.mxu1 %v3530_v8  ;;  %990 = vmatmul.mubr.bf16.gmra.mxu0 %v3513_v63 }
  0x92   : > { %1178 = vmatpush1.bf16.msra.mxu0 %v3519_v3  ;;  %999 = vmatprep.mubr.bf16.mxu0 %v3516_v1 }
  0x93   : > { %1113 = vmatmul.mubr.bf16.gmra.mxu1 %v3533_v9  ;;  %1179 = vmatprep.subr.bf16.mxu0 %v3522_v4 }
  0x94   : > { %1122 = vmatprep.mubr.bf16.mxu1 %v3536_v11  ;;  %2743 = vmatpush1.bf16.msra.mxu1 %v3539_v14 }
  0x95   : > { %2728 = vmatprep.subr.bf16.mxu1 %v3542_v15 }
  0x96   : > { %1180 = vmatpush1.bf16.msra.mxu0 %v3527_v7 }
  0x97   : > { %1181 = vmatprep.subr.bf16.mxu0 %v3530_v8 }
  0x98   : > { %2744 = vmatpush1.bf16.msra.mxu1 %v3547_v18 }
  0x99   : > { %2729 = vmatprep.subr.bf16.mxu1 %v3550_v19  ;;  %1000 = vmatmul.mubr.bf16.gmra.mxu0 %v3533_v9 }
  0x9a   : > { %1182 = vmatpush1.bf16.msra.mxu0 %v3539_v14  ;;  %1009 = vmatprep.mubr.bf16.mxu0 %v3536_v11 }
  0x9b   : > { %1123 = vmatmul.mubr.bf16.gmra.mxu1 %v3553_v20  ;;  %1183 = vmatprep.subr.bf16.mxu0 %v3542_v15 }
  0x9c   : > { %1132 = vmatprep.mubr.bf16.mxu1 %v3556_v22  ;;  %2745 = vmatpush1.bf16.msra.mxu1 %v3559_v23 }
  0x9d   : > { %2730 = vmatprep.subr.bf16.mxu1 %v3562_v24 }
  0x9e   : > { %1184 = vmatpush1.bf16.msra.mxu0 %v3547_v18 }
  0x9f   : > { %1185 = vmatprep.subr.bf16.mxu0 %v3550_v19 }
  0xa0   : > { %2746 = vmatpush1.bf16.msra.mxu1 %v3568_v25 }
  0xa1   : > { %2731 = vmatprep.subr.bf16.mxu1 %v3572_v26  ;;  %1010 = vmatmul.mubr.bf16.gmra.mxu0 %v3553_v20 }
  0xa2   : > { %1186 = vmatpush1.bf16.msra.mxu0 %v3559_v23  ;;  %1019 = vmatprep.mubr.bf16.mxu0 %v3556_v22 }
  0xa3   : > { %1133 = vmatmul.mubr.bf16.gmra.mxu1 %v3575_v27  ;;  %1187 = vmatprep.subr.bf16.mxu0 %v3562_v24 }
  0xa4   : > { %1142 = vmatprep.mubr.bf16.mxu1 %v3580_v28  ;;  %2747 = vmatpush2.bf16.msra.mxu1 %v3584_v29 }
  0xa5   : > { %2732 = vmatprep.subr.bf16.mxu1 %v3587_v30 }
  0xa6   : > { %1188 = vmatpush1.bf16.msra.mxu0 %v3568_v25 }
  0xa7   : > { %1189 = vmatprep.subr.bf16.mxu0 %v3572_v26 }
  0xa8   : > { %2748 = vmatpush2.bf16.msra.mxu1 %v3103_v31 }
  0xa9   : > { %2733 = vmatprep.subr.bf16.mxu1 %v3108_v32  ;;  %1020 = vmatmul.mubr.bf16.gmra.mxu0 %v3575_v27 }
  0xaa   : > { %1190 = vmatpush2.bf16.msra.mxu0 %v3584_v29  ;;  %1029 = vmatprep.mubr.bf16.mxu0 %v3580_v28 }
  0xab   : > { %1143 = vmatmul.mubr.bf16.gmra.mxu1 %v3597_v33  ;;  %1191 = vmatprep.subr.bf16.mxu0 %v3587_v30 }
  0xac   : > { %1152 = vmatprep.mubr.bf16.mxu1 %v3602_v34  ;;  %2749 = vmatpush2.bf16.msra.mxu1 %v3106_v35 }
  0xad   : > { %2734 = vmatprep.subr.bf16.mxu1 %v3111_v36 }
  0xae   : > { %1192 = vmatpush2.bf16.msra.mxu0 %v3103_v31 }
  0xaf   : > { %1193 = vmatprep.subr.bf16.mxu0 %v3108_v32 }
  0xb0   : > { %2750 = vmatpush2.bf16.msra.mxu1 %v3109_v37 }
  0xb1   : > { %2735 = vmatprep.subr.bf16.mxu1 %v3114_v38  ;;  %1030 = vmatmul.mubr.bf16.gmra.mxu0 %v3597_v33 }
  0xb2   : > { %1194 = vmatpush2.bf16.msra.mxu0 %v3106_v35  ;;  %1039 = vmatprep.mubr.bf16.mxu0 %v3602_v34 }
  0xb3   : > { %1153 = vmatmul.mubr.bf16.gmra.mxu1 %v3041_v39  ;;  %1195 = vmatprep.subr.bf16.mxu0 %v3111_v36 }
  0xb4   : > { %1162 = vmatprep.mubr.bf16.mxu1 %v3046_v40  ;;  %2751 = vmatpush2.bf16.msra.mxu1 %v3112_v41 }
  0xb5   : > { %2736 = vmatprep.subr.bf16.mxu1 %v3117_v42 }
  0xb6   : > { %1196 = vmatpush2.bf16.msra.mxu0 %v3109_v37 }
  0xb7   : > { %1197 = vmatprep.subr.bf16.mxu0 %v3114_v38 }
  0xb8   : > { %2752 = vmatpush2.bf16.msra.mxu1 %v3115_v43 }
  0xb9   : > { %2737 = vmatprep.subr.bf16.mxu1 %v3120_v44  ;;  %1040 = vmatmul.mubr.bf16.gmra.mxu0 %v3041_v39 }
  0xba   : > { %1198 = vmatpush2.bf16.msra.mxu0 %v3112_v41  ;;  %1049 = vmatprep.mubr.bf16.mxu0 %v3046_v40 }
  0xbb   : > { %1163 = vmatmul.mubr.bf16.gmra.mxu1 %v3050_v45  ;;  %1199 = vmatprep.subr.bf16.mxu0 %v3117_v42 }
  0xbc   : > { %1245 = vmatprep.mubr.bf16.mxu1 %v3556_v22  ;;  %2753 = vmatpush2.bf16.msra.mxu1 %v3118_v46 }
  0xbd   : > { %2738 = vmatprep.subr.bf16.mxu1 %v3123_v47 }
  0xbe   : > { %1200 = vmatpush2.bf16.msra.mxu0 %v3115_v43 }
  0xbf   : > { %1201 = vmatprep.subr.bf16.mxu0 %v3120_v44 }
  0xc0   : > { %2754 = vmatpush2.bf16.msra.mxu1 %v3121_v48 }
  0xc1   : > { %1050 = vmatmul.mubr.bf16.gmra.mxu0 %v3050_v45 }
  0xc2   : > { %1202 = vmatpush2.bf16.msra.mxu0 %v3118_v46  ;;  %1205 = vmatprep.mubr.bf16.mxu0 %v3487_v13 }
  0xc3   : > { %1246 = vmatmul.mubr.bf16.vlgmr.msra.gmra.mxu1 %v3575_v27  ;;  %1203 = vmatprep.subr.bf16.mxu0 %v3123_v47 }
  0xc4   : > { %1255 = vmatprep.mubr.bf16.mxu1 %v3580_v28 }
  0xc6   : > { %1204 = vmatpush2.bf16.msra.mxu0 %v3121_v48 }
  0xc9   : > { %1206 = vmatmul.mubr.bf16.vlgmr.msra.gmra.mxu0 %v3494_v53 }
  0xca   : > { %1215 = vmatprep.mubr.bf16.mxu0 %v3497_v55 }
  0xcb   : > { %1256 = vmatmul.mubr.bf16.gmra.mxu1 %v3597_v33 }
  0xcc   : > { %1265 = vmatprep.mubr.bf16.mxu1 %v3602_v34 }
  0xd1   : > { %1216 = vmatmul.mubr.bf16.gmra.mxu0 %v3513_v63 }
  0xd2   : > { %1225 = vmatprep.mubr.bf16.mxu0 %v3516_v1 }
  0xd3   : > { %1266 = vmatmul.mubr.bf16.gmra.mxu1 %v3041_v39 }
  0xd4   : > { %1275 = vmatprep.mubr.bf16.mxu1 %v3046_v40 }
  0xd9   : > { %1226 = vmatmul.mubr.bf16.gmra.mxu0 %v3533_v9 }
  0xda   : > { %1235 = vmatprep.mubr.bf16.mxu0 %v3536_v11 }
  0xdb   : > { %1276 = vmatmul.mubr.bf16.gmra.mxu1 %v3050_v45 }
  0xe1   : > { %1236 = vmatmul.mubr.bf16.gmra.mxu0 %v3553_v20 }
 0x143   : > { %v1094_v49 = vpop.f32.mrf.mxu1 }
 0x145   : > { %v1096_v50 = vpop.f32.mrf.mxu1 }
 0x146   : > { %v2844_v13 = vpack.i.bf16 %v1096_v50, %v1094_v49 }
 0x147   : > { %v1098_v51 = vpop.f32.mrf.mxu1 }
 0x148   : > { %2845 = vxpose.xlu0.b32.start [1/16] %v2844_v13, 128 }
 0x149   : > { %v1100_v52 = vpop.f32.mrf.mxu1  ;;  %v981_v5 = vpop.f32.mrf.mxu0 }
 0x14a   : > { %v2846_v54 = vpack.i.bf16 %v1100_v52, %v1098_v51 }
 0x14b   : > { %v1104_v53 = vpop.f32.mrf.mxu1  ;;  %v983_v7 = vpop.f32.mrf.mxu0 }
 0x14c   : > { %2847 = vxpose.xlu0.b32.cont [2/16] %v2846_v54, 128 }
 0x14d   : > { %v1106_v55 = vpop.f32.mrf.mxu1  ;;  %v985_v10 = vpop.f32.mrf.mxu0 }
 0x14e   : > { %v2848_v56 = vpack.i.bf16 %v1106_v55, %v1104_v53  ;;  %v2441_v12 = vpack.c.bf16 %v985_v10, %v981_v5 }
 0x14f   : > { %v1108_v57 = vpop.f32.mrf.mxu1  ;;  %v987_v14 = vpop.f32.mrf.mxu0 }
 0x150   : > { %2849 = vxpose.xlu0.b32.cont [3/16] %v2848_v56, 128  ;;  %2442 = vst [vmem:[%s3644_s22] sm:$0xff] %v2441_v12   ;;  %v2561_v16 = vpack.c.bf16 %v987_v14, %v983_v7 }
 0x151   : > { %v1110_v58 = vpop.f32.mrf.mxu1  ;;  %v991_v18 = vpop.f32.mrf.mxu0 }
 0x152   : > { %v2850_v59 = vpack.i.bf16 %v1110_v58, %v1108_v57  ;;  %2699 = vst [vmem:[%s3644_s22 + $0x40] sm:$0xff] %v2561_v16  }
 0x153   : > { %v1114_v60 = vpop.f32.mrf.mxu1  ;;  %v993_v20 = vpop.f32.mrf.mxu0 }
 0x154   : > { %2851 = vxpose.xlu0.b32.cont [4/16] %v2850_v59, 128 }
 0x155   : > { %v1116_v61 = vpop.f32.mrf.mxu1  ;;  %v995_v23 = vpop.f32.mrf.mxu0 }
 0x156   : > { %v2852_v62 = vpack.i.bf16 %v1116_v61, %v1114_v60  ;;  %v2446_v25 = vpack.c.bf16 %v995_v23, %v991_v18 }
 0x157   : > { %v1118_v63 = vpop.f32.mrf.mxu1  ;;  %v997_v26 = vpop.f32.mrf.mxu0 }
 0x158   : > { %2853 = vxpose.xlu0.b32.cont [5/16] %v2852_v62, 128  ;;  %2678 = vst [vmem:[%s3644_s22 + $0x8] sm:$0xff] %v2446_v25   ;;  %v2566_v28 = vpack.c.bf16 %v997_v26, %v993_v20 }
 0x159   : > { %v1120_v0 = vpop.f32.mrf.mxu1  ;;  %v1001_v30 = vpop.f32.mrf.mxu0 }
 0x15a   : > { %v2854_v1 = vpack.i.bf16 %v1120_v0, %v1118_v63  ;;  %2700 = vst [vmem:[%s3644_s22 + $0x48] sm:$0xff] %v2566_v28  }
 0x15b   : > { %v1124_v2 = vpop.f32.mrf.mxu1  ;;  %v1003_v32 = vpop.f32.mrf.mxu0 }
 0x15c   : > { %2855 = vxpose.xlu0.b32.cont [6/16] %v2854_v1, 128 }
 0x15d   : > { %v1126_v3 = vpop.f32.mrf.mxu1  ;;  %v1005_v35 = vpop.f32.mrf.mxu0 }
 0x15e   : > { %v2856_v4 = vpack.i.bf16 %v1126_v3, %v1124_v2  ;;  %v2451_v37 = vpack.c.bf16 %v1005_v35, %v1001_v30 }
 0x15f   : > { %v1128_v6 = vpop.f32.mrf.mxu1  ;;  %v1007_v38 = vpop.f32.mrf.mxu0 }
 0x160   : > { %2857 = vxpose.xlu0.b32.cont [7/16] %v2856_v4, 128  ;;  %2679 = vst [vmem:[%s3644_s22 + $0x10] sm:$0xff] %v2451_v37   ;;  %v2571_v40 = vpack.c.bf16 %v1007_v38, %v1003_v32 }
 0x161   : > { %v1130_v8 = vpop.f32.mrf.mxu1  ;;  %v1011_v42 = vpop.f32.mrf.mxu0 }
 0x162   : > { %v2858_v9 = vpack.i.bf16 %v1130_v8, %v1128_v6  ;;  %2701 = vst [vmem:[%s3644_s22 + $0x50] sm:$0xff] %v2571_v40  }
 0x163   : > { %v1134_v11 = vpop.f32.mrf.mxu1  ;;  %v1013_v44 = vpop.f32.mrf.mxu0 }
 0x164   : > { %2859 = vxpose.xlu0.b32.cont [8/16] %v2858_v9, 128 }
 0x165   : > { %v1136_v15 = vpop.f32.mrf.mxu1  ;;  %v1015_v47 = vpop.f32.mrf.mxu0 }
 0x166   : > { %v2860_v17 = vpack.i.bf16 %v1136_v15, %v1134_v11  ;;  %v2456_v49 = vpack.c.bf16 %v1015_v47, %v1011_v42 }
 0x167   : > { %v1138_v19 = vpop.f32.mrf.mxu1  ;;  %v1017_v50 = vpop.f32.mrf.mxu0 }
 0x168   : > { %2861 = vxpose.xlu0.b32.cont [9/16] %v2860_v17, 128  ;;  %2680 = vst [vmem:[%s3644_s22 + $0x18] sm:$0xff] %v2456_v49   ;;  %v2576_v51 = vpack.c.bf16 %v1017_v50, %v1013_v44 }
 0x169   : > { %v1140_v21 = vpop.f32.mrf.mxu1  ;;  %v1021_v54 = vpop.f32.mrf.mxu0 }
 0x16a   : > { %v2862_v22 = vpack.i.bf16 %v1140_v21, %v1138_v19  ;;  %2702 = vst [vmem:[%s3644_s22 + $0x58] sm:$0xff] %v2576_v51  }
 0x16b   : > { %v1144_v24 = vpop.f32.mrf.mxu1  ;;  %v1023_v55 = vpop.f32.mrf.mxu0 }
 0x16c   : > { %2863 = vxpose.xlu0.b32.cont [10/16] %v2862_v22, 128 }
 0x16d   : > { %v1146_v27 = vpop.f32.mrf.mxu1  ;;  %v1025_v58 = vpop.f32.mrf.mxu0 }
 0x16e   : > { %v2864_v29 = vpack.i.bf16 %v1146_v27, %v1144_v24  ;;  %v2461_v59 = vpack.c.bf16 %v1025_v58, %v1021_v54 }
 0x16f   : > { %v1148_v31 = vpop.f32.mrf.mxu1  ;;  %v1027_v60 = vpop.f32.mrf.mxu0 }
 0x170   : > { %2865 = vxpose.xlu0.b32.cont [11/16] %v2864_v29, 128  ;;  %2681 = vst [vmem:[%s3644_s22 + $0x20] sm:$0xff] %v2461_v59   ;;  %v2581_v62 = vpack.c.bf16 %v1027_v60, %v1023_v55 }
 0x171   : > { %v1150_v33 = vpop.f32.mrf.mxu1  ;;  %v1031_v63 = vpop.f32.mrf.mxu0 }
 0x172   : > { %v2866_v34 = vpack.i.bf16 %v1150_v33, %v1148_v31  ;;  %2703 = vst [vmem:[%s3644_s22 + $0x60] sm:$0xff] %v2581_v62  }
 0x173   : > { %v1154_v36 = vpop.f32.mrf.mxu1  ;;  %v1033_v1 = vpop.f32.mrf.mxu0 }
 0x174   : > { %2867 = vxpose.xlu0.b32.cont [12/16] %v2866_v34, 128 }
 0x175   : > { %v1156_v39 = vpop.f32.mrf.mxu1  ;;  %v1035_v4 = vpop.f32.mrf.mxu0 }
 0x176   : > { %v2868_v41 = vpack.i.bf16 %v1156_v39, %v1154_v36  ;;  %v2466_v6 = vpack.c.bf16 %v1035_v4, %v1031_v63 }
 0x177   : > { %v1158_v43 = vpop.f32.mrf.mxu1  ;;  %v1037_v8 = vpop.f32.mrf.mxu0 }
 0x178   : > { %2869 = vxpose.xlu0.b32.cont [13/16] %v2868_v41, 128  ;;  %2682 = vst [vmem:[%s3644_s22 + $0x28] sm:$0xff] %v2466_v6   ;;  %v2586_v10 = vpack.c.bf16 %v1037_v8, %v1033_v1 }
 0x179   : > { %v1160_v45 = vpop.f32.mrf.mxu1  ;;  %v1041_v11 = vpop.f32.mrf.mxu0 }
 0x17a   : > { %v2870_v46 = vpack.i.bf16 %v1160_v45, %v1158_v43  ;;  %2704 = vst [vmem:[%s3644_s22 + $0x68] sm:$0xff] %v2586_v10  }
 0x17b   : > { %v1164_v48 = vpop.f32.mrf.mxu1  ;;  %v1043_v14 = vpop.f32.mrf.mxu0 }
 0x17c   : > { %2871 = vxpose.xlu0.b32.cont [14/16] %v2870_v46, 128 }
 0x17d   : > { %v1166_v13 = vpop.f32.mrf.mxu1  ;;  %v1045_v17 = vpop.f32.mrf.mxu0 }
 0x17e   : > { %v2872_v52 = vpack.i.bf16 %v1166_v13, %v1164_v48  ;;  %v2471_v19 = vpack.c.bf16 %v1045_v17, %v1041_v11 }
 0x17f   : > { %v1168_v53 = vpop.f32.mrf.mxu1  ;;  %v1047_v21 = vpop.f32.mrf.mxu0 }
 0x180   : > { %2873 = vxpose.xlu0.b32.cont [15/16] %v2872_v52, 128  ;;  %2683 = vst [vmem:[%s3644_s22 + $0x30] sm:$0xff] %v2471_v19   ;;  %v2591_v23 = vpack.c.bf16 %v1047_v21, %v1043_v14 }
 0x181   : > { %v1170_v56 = vpop.f32.mrf.mxu1  ;;  %v1051_v24 = vpop.f32.mrf.mxu0 }
 0x182   : > { %v2874_v57 = vpack.i.bf16 %v1170_v56, %v1168_v53  ;;  %2705 = vst [vmem:[%s3644_s22 + $0x70] sm:$0xff] %v2591_v23  }
 0x183   : > { %v1247_v61 = vpop.f32.mrf.mxu1  ;;  %v1053_v26 = vpop.f32.mrf.mxu0 }
 0x184   : > { %2875 = vxpose.xlu0.b32.end [16/16] %v2874_v57, 128 }
 0x185   : > { %v1249_v0 = vpop.f32.mrf.mxu1  ;;  %v1055_v29 = vpop.f32.mrf.mxu0 }
 0x186   : > { %v2476_v31 = vpack.c.bf16 %v1055_v29, %v1051_v24 }
 0x187   : > { %v1251_v2 = vpop.f32.mrf.mxu1  ;;  %v1057_v33 = vpop.f32.mrf.mxu0 }
 0x188   : > { %v2541_v3 = vpack.c.bf16 %v1251_v2, %v1247_v61  ;;  %2684 = vst [vmem:[%s3644_s22 + $0x38] sm:$0xff] %v2476_v31   ;;  %v2596_v35 = vpack.c.bf16 %v1057_v33, %v1053_v26 }
 0x189   : > { %v1253_v5 = vpop.f32.mrf.mxu1  ;;  %v1207_v36 = vpop.f32.mrf.mxu0 }
 0x18a   : > { %2695 = vst [vmem:[%s3657_s23 + $0x20] sm:$0xff] %v2541_v3   ;;  %v2661_v7 = vpack.c.bf16 %v1253_v5, %v1249_v0  ;;  %2706 = vst [vmem:[%s3644_s22 + $0x78] sm:$0xff] %v2596_v35  }
 0x18b   : > { %v1257_v9 = vpop.f32.mrf.mxu1  ;;  %v1209_v38 = vpop.f32.mrf.mxu0 }
 0x18c   : > { %2719 = vst [vmem:[%s3657_s23 + $0x60] sm:$0xff] %v2661_v7  }
 0x18d   : > { %v1259_v12 = vpop.f32.mrf.mxu1 }
 0x18f   : > { %v1261_v15 = vpop.f32.mrf.mxu1 }
 0x190   : > { %v2546_v16 = vpack.c.bf16 %v1261_v15, %v1257_v9 }
 0x191   : > { %v1263_v18 = vpop.f32.mrf.mxu1 }
 0x192   : > { %2696 = vst [vmem:[%s3657_s23 + $0x28] sm:$0xff] %v2546_v16   ;;  %v2666_v20 = vpack.c.bf16 %v1263_v18, %v1259_v12 }
 0x193   : > { %v1267_v22 = vpop.f32.mrf.mxu1 }
 0x194   : > { %2720 = vst [vmem:[%s3657_s23 + $0x68] sm:$0xff] %v2666_v20  }
 0x195   : > { %v1269_v25 = vpop.f32.mrf.mxu1 }
 0x197   : > { %v1271_v27 = vpop.f32.mrf.mxu1 }
 0x198   : > { %v2551_v28 = vpack.c.bf16 %v1271_v27, %v1267_v22 }
 0x199   : > { %v1273_v30 = vpop.f32.mrf.mxu1 }
 0x19a   : > { %2697 = vst [vmem:[%s3657_s23 + $0x30] sm:$0xff] %v2551_v28   ;;  %v2671_v32 = vpack.c.bf16 %v1273_v30, %v1269_v25 }
 0x19b   : > { %v1277_v34 = vpop.f32.mrf.mxu1 }
 0x19c   : > { %2721 = vst [vmem:[%s3657_s23 + $0x70] sm:$0xff] %v2671_v32  }
 0x19d   : > { %v1279_v37 = vpop.f32.mrf.mxu1 }
 0x19f   : > { %v1281_v39 = vpop.f32.mrf.mxu1 }
 0x1a0   : > { %3191 = shalt.err (!%p3188_p2)
}
 0x1a1   : > { %s3192_s14 = scalar_lea.hbm %s3678_s8, 2048  ;;  %s3196_s22 = scalar_lea.hbm %s3834_s2, 4096 }
 0x1a2   : > { %p3193_p6 = scmp.ne.s32.totalorder %s3678_s8, %s3192_s14  ;;  %p3197_p11 = scmp.lt.s32.totalorder %s3678_s8, %s3834_s2 }
 0x1a3   : > { %p3198_p1 = scmp.lt.s32.totalorder %s3196_s22, %s3192_s14 }
 0x1a4   : > { %p3194_p9 = pnand %p3193_p6, %p3441_p0 }
 0x1a5   : > { %p3199_p8 = por %p3198_p1, %p3197_p11 }
 0x1a6   : > { %p3195_p13 = pneg %p3194_p9 }
 0x1a8   : > { %p3200_p4 = pnand %p3199_p8, %p3195_p13 }
 0x1aa   : > { %3203 = shalt.err (!%p3200_p4)
}
 0x1ab   : > { %s3327_s12 = smov 64   ;;  %s3328_s9 = smov 4   ;;  %v2556_v40 = vpack.c.bf16 %v1281_v39, %v1277_v34  ;;  %v1211_v41 = vpop.f32.mrf.mxu0  ;;  %v1283_v42 = vpop.f32.mrf.mxu1 }
 0x1ac   : > { %2761 = dma.vmem_to_hbm [thread:$0]  (%p3441_p0), %s3680_s5, 2048, %s3678_s8, %s1834_s18, %s3327_s12, %s3327_s12, %s3328_s9   ;;  %v2521_v43 = vpack.c.bf16 %v1211_v41, %v1207_v36  ;;  %v2676_v44 = vpack.c.bf16 %v1283_v42, %v1279_v37 }
 0x1ad   : > { %2698 = vst [vmem:[%s3657_s23 + $0x38] sm:$0xff] %v2556_v40   ;;  %v1213_v45 = vpop.f32.mrf.mxu0  ;;  %s3720_s13 = scalar_lea.vmem [#allocation8], %s3472_s28  ;;  %s1838_s28 = sand.u32 1, %s3387_s21  }
 0x1ae   : > { %2522 = vst [vmem:[%s3657_s23] sm:$0xff] %v2521_v43   ;;  %v2641_v46 = vpack.c.bf16 %v1213_v45, %v1209_v38  ;;  %2722 = vst [vmem:[%s3657_s23 + $0x78] sm:$0xff] %v2676_v44   ;;  %s1876_s5 = sshll.u32 %s3720_s13, 4  ;;  %s1894_s8 = sshll.u32 %s3657_s23, 4  ;;  %s3745_s5 = int_to_ptr.vmem [resolvable:$true] %s1876_s5  ;;  %s3753_s8 = int_to_ptr.vmem [resolvable:$true] %s1894_s8 }
 0x1af   : > { %v1217_v47 = vpop.f32.mrf.mxu0  ;;  %s3743_s10 = scalar_lea.hbm %s3835_s3, %s3668_s25  ;;  %s3751_s21 = scalar_lea.hbm %s3836_s4, %s3668_s25 }
 0x1b0   : > { %2715 = vst [vmem:[%s3657_s23 + $0x40] sm:$0xff] %v2641_v46   ;;  %s3204_s30 = scalar_lea.vmem %s3745_s5, 2048  ;;  %s3329_s22 = smov [#allocation8]  }
 0x1b1   : > { %v1219_v48 = vpop.f32.mrf.mxu0  ;;  %p3205_p10 = scmp.ne.s32.totalorder %s3745_s5, %s3204_s30  ;;  %s3208_s6 = sshll.u32 %s3329_s22, 4  ;;  %s3209_s6 = int_to_ptr.vmem [resolvable:$false] %s3208_s6 }
 0x1b2   : > { %s3210_s7 = scalar_lea.vmem %s3209_s6, 4096  ;;  %p3211_p5 = scmp.lt.s32.totalorder %s3745_s5, %s3209_s6 }
 0x1b3   : > { %v1221_v49 = vpop.f32.mrf.mxu0  ;;  %p3206_p12 = pnand %p3205_p10, %p3441_p0  ;;  %p3212_p7 = scmp.lt.s32.totalorder %s3210_s7, %s3204_s30 }
 0x1b4   : > { %v2526_v50 = vpack.c.bf16 %v1221_v49, %v1217_v47 }
 0x1b5   : > { %v1223_v13 = vpop.f32.mrf.mxu0  ;;  %p3207_p3 = pneg %p3206_p12  ;;  %p3213_p2 = por %p3212_p7, %p3211_p5 }
 0x1b6   : > { %2692 = vst [vmem:[%s3657_s23 + $0x8] sm:$0xff] %v2526_v50   ;;  %v2646_v51 = vpack.c.bf16 %v1223_v13, %v1219_v48 }
 0x1b7   : > { %v1227_v52 = vpop.f32.mrf.mxu0  ;;  %p3214_p6 = pnand %p3213_p2, %p3207_p3 }
 0x1b8   : > { %2716 = vst [vmem:[%s3657_s23 + $0x48] sm:$0xff] %v2646_v51  }
 0x1b9   : > { %v1229_v54 = vpop.f32.mrf.mxu0 }
 0x1bb   : > { %v1231_v53 = vpop.f32.mrf.mxu0 }
 0x1bc   : > { %v2531_v55 = vpack.c.bf16 %v1231_v53, %v1227_v52 }
 0x1bd   : > { %v1233_v56 = vpop.f32.mrf.mxu0 }
 0x1be   : > { %2693 = vst [vmem:[%s3657_s23 + $0x10] sm:$0xff] %v2531_v55   ;;  %v2651_v57 = vpack.c.bf16 %v1233_v56, %v1229_v54 }
 0x1bf   : > { %v1237_v58 = vpop.f32.mrf.mxu0 }
 0x1c0   : > { %2717 = vst [vmem:[%s3657_s23 + $0x50] sm:$0xff] %v2651_v57  }
 0x1c1   : > { %v1239_v59 = vpop.f32.mrf.mxu0 }
 0x1c3   : > { %v1241_v60 = vpop.f32.mrf.mxu0 }
 0x1c4   : > { %v2536_v61 = vpack.c.bf16 %v1241_v60, %v1237_v58  ;;  %v2876_v0 = vpop.trf.xlu0 }
 0x1c5   : > { %v1243_v62 = vpop.f32.mrf.mxu0  ;;  %v2880_v1 = vunpack.i.h.bf16 %v2876_v0  ;;  %v2877_v2 = vunpack.i.l.bf16 %v2876_v0 }
 0x1c6   : > { %2694 = vst [vmem:[%s3657_s23 + $0x18] sm:$0xff] %v2536_v61   ;;  %v2656_v63 = vpack.c.bf16 %v1243_v62, %v1239_v59 }
 0x1c8   : > { %2718 = vst [vmem:[%s3657_s23 + $0x58] sm:$0xff] %v2656_v63   ;;  %v2881_v3 = vpop.trf.xlu0  ;;  %s3757_s23 = scalar_lea.sflag [#allocation9], %s1838_s28 }
 0x1c9   : > { %v2885_v4 = vunpack.i.h.bf16 %v2881_v3  ;;  %v2882_v5 = vunpack.i.l.bf16 %v2881_v3 }
 0x1cb   : > { %v2481_v6 = vpack.c.bf16 %v2882_v5, %v2877_v2  ;;  %v2601_v7 = vpack.c.bf16 %v2885_v4, %v2880_v1 }
 0x1cc   : > { %v2886_v8 = vpop.trf.xlu0 }
 0x1cd   : > { %2482 = vst [vmem:[%s3720_s13] sm:$0xff] %v2481_v6   ;;  %2707 = vst [vmem:[%s3720_s13 + $0x40] sm:$0xff] %v2601_v7   ;;  %v2890_v9 = vunpack.i.h.bf16 %v2886_v8  ;;  %v2887_v10 = vunpack.i.l.bf16 %v2886_v8 }
 0x1d0   : > { %v2891_v11 = vpop.trf.xlu0 }
 0x1d1   : > { %v2895_v12 = vunpack.i.h.bf16 %v2891_v11  ;;  %v2892_v14 = vunpack.i.l.bf16 %v2891_v11 }
 0x1d3   : > { %v2486_v15 = vpack.c.bf16 %v2892_v14, %v2887_v10  ;;  %v2606_v16 = vpack.c.bf16 %v2895_v12, %v2890_v9 }
 0x1d4   : > { %v2896_v17 = vpop.trf.xlu0 }
 0x1d5   : > { %2685 = vst [vmem:[%s3720_s13 + $0x8] sm:$0xff] %v2486_v15   ;;  %2708 = vst [vmem:[%s3720_s13 + $0x48] sm:$0xff] %v2606_v16   ;;  %v2900_v18 = vunpack.i.h.bf16 %v2896_v17  ;;  %v2897_v19 = vunpack.i.l.bf16 %v2896_v17 }
 0x1d8   : > { %v2901_v20 = vpop.trf.xlu0 }
 0x1d9   : > { %v2905_v21 = vunpack.i.h.bf16 %v2901_v20  ;;  %v2902_v22 = vunpack.i.l.bf16 %v2901_v20 }
 0x1db   : > { %v2491_v23 = vpack.c.bf16 %v2902_v22, %v2897_v19  ;;  %v2611_v24 = vpack.c.bf16 %v2905_v21, %v2900_v18 }
 0x1dc   : > { %v2906_v25 = vpop.trf.xlu0 }
 0x1dd   : > { %2686 = vst [vmem:[%s3720_s13 + $0x10] sm:$0xff] %v2491_v23   ;;  %2709 = vst [vmem:[%s3720_s13 + $0x50] sm:$0xff] %v2611_v24   ;;  %v2910_v26 = vunpack.i.h.bf16 %v2906_v25  ;;  %v2907_v27 = vunpack.i.l.bf16 %v2906_v25 }
 0x1e0   : > { %v2911_v28 = vpop.trf.xlu0 }
 0x1e1   : > { %v2915_v29 = vunpack.i.h.bf16 %v2911_v28  ;;  %v2912_v30 = vunpack.i.l.bf16 %v2911_v28 }
 0x1e3   : > { %v2496_v31 = vpack.c.bf16 %v2912_v30, %v2907_v27  ;;  %v2616_v32 = vpack.c.bf16 %v2915_v29, %v2910_v26 }
 0x1e4   : > { %v2916_v33 = vpop.trf.xlu0 }
 0x1e5   : > { %2687 = vst [vmem:[%s3720_s13 + $0x18] sm:$0xff] %v2496_v31   ;;  %2710 = vst [vmem:[%s3720_s13 + $0x58] sm:$0xff] %v2616_v32   ;;  %v2920_v34 = vunpack.i.h.bf16 %v2916_v33  ;;  %v2917_v35 = vunpack.i.l.bf16 %v2916_v33 }
 0x1e8   : > { %v2921_v36 = vpop.trf.xlu0 }
 0x1e9   : > { %v2925_v37 = vunpack.i.h.bf16 %v2921_v36  ;;  %v2922_v38 = vunpack.i.l.bf16 %v2921_v36 }
 0x1eb   : > { %v2501_v39 = vpack.c.bf16 %v2922_v38, %v2917_v35  ;;  %v2621_v40 = vpack.c.bf16 %v2925_v37, %v2920_v34 }
 0x1ec   : > { %v2926_v41 = vpop.trf.xlu0 }
 0x1ed   : > { %2688 = vst [vmem:[%s3720_s13 + $0x20] sm:$0xff] %v2501_v39   ;;  %2711 = vst [vmem:[%s3720_s13 + $0x60] sm:$0xff] %v2621_v40   ;;  %v2930_v42 = vunpack.i.h.bf16 %v2926_v41  ;;  %v2927_v43 = vunpack.i.l.bf16 %v2926_v41 }
 0x1f0   : > { %v2931_v44 = vpop.trf.xlu0 }
 0x1f1   : > { %v2935_v45 = vunpack.i.h.bf16 %v2931_v44  ;;  %v2932_v46 = vunpack.i.l.bf16 %v2931_v44 }
 0x1f3   : > { %v2506_v47 = vpack.c.bf16 %v2932_v46, %v2927_v43  ;;  %v2626_v48 = vpack.c.bf16 %v2935_v45, %v2930_v42 }
 0x1f4   : > { %v2936_v49 = vpop.trf.xlu0 }
 0x1f5   : > { %2689 = vst [vmem:[%s3720_s13 + $0x28] sm:$0xff] %v2506_v47   ;;  %2712 = vst [vmem:[%s3720_s13 + $0x68] sm:$0xff] %v2626_v48   ;;  %v2940_v50 = vunpack.i.h.bf16 %v2936_v49  ;;  %v2937_v13 = vunpack.i.l.bf16 %v2936_v49 }
 0x1f8   : > { %v2941_v51 = vpop.trf.xlu0 }
 0x1f9   : > { %v2945_v52 = vunpack.i.h.bf16 %v2941_v51  ;;  %v2942_v54 = vunpack.i.l.bf16 %v2941_v51 }
 0x1fb   : > { %v2511_v53 = vpack.c.bf16 %v2942_v54, %v2937_v13  ;;  %v2631_v55 = vpack.c.bf16 %v2945_v52, %v2940_v50 }
 0x1fc   : > { %v2946_v56 = vpop.trf.xlu0 }
 0x1fd   : > { %2690 = vst [vmem:[%s3720_s13 + $0x30] sm:$0xff] %v2511_v53   ;;  %2713 = vst [vmem:[%s3720_s13 + $0x70] sm:$0xff] %v2631_v55   ;;  %v2950_v57 = vunpack.i.h.bf16 %v2946_v56  ;;  %v2947_v58 = vunpack.i.l.bf16 %v2946_v56 }
 0x200   : > { %v2951_v59 = vpop.trf.xlu0 }
 0x201   : > { %v2955_v60 = vunpack.i.h.bf16 %v2951_v59  ;;  %v2952_v61 = vunpack.i.l.bf16 %v2951_v59 }
 0x203   : > { %v2516_v62 = vpack.c.bf16 %v2952_v61, %v2947_v58  ;;  %v2636_v63 = vpack.c.bf16 %v2955_v60, %v2950_v57 }
 0x205   : > { %2691 = vst [vmem:[%s3720_s13 + $0x38] sm:$0xff] %v2516_v62   ;;  %2714 = vst [vmem:[%s3720_s13 + $0x78] sm:$0xff] %v2636_v63  }
 0x206   : > { %3217 = shalt.err (!%p3214_p6)
}
 0x207   : > { %s3218_s25 = scalar_lea.hbm %s3743_s10, 2048  ;;  %s3222_s18 = scalar_lea.hbm %s3835_s3, 4096 }
 0x208   : > { %p3219_p9 = scmp.ne.s32.totalorder %s3743_s10, %s3218_s25  ;;  %p3223_p1 = scmp.lt.s32.totalorder %s3743_s10, %s3835_s3 }
 0x209   : > { %p3224_p8 = scmp.lt.s32.totalorder %s3222_s18, %s3218_s25 }
 0x20a   : > { %p3220_p13 = pnand %p3219_p9, %p3441_p0 }
 0x20b   : > { %p3225_p4 = por %p3224_p8, %p3223_p1 }
 0x20c   : > { %p3221_p11 = pneg %p3220_p13 }
 0x20e   : > { %p3226_p10 = pnand %p3225_p4, %p3221_p11 }
 0x210   : > { %3229 = shalt.err (!%p3226_p10)
}
 0x211   : > { %2762 = dma.vmem_to_hbm [thread:$0]  (%p3441_p0), %s3745_s5, 2048, %s3743_s10, %s3757_s23, %s3327_s12, %s3327_s12, %s3328_s9  }
 0x212   : > { %s3230_s1 = scalar_lea.vmem %s3753_s8, 2048  ;;  %s3330_s30 = smov [#allocation10]  }
 0x213   : > { %p3231_p12 = scmp.ne.s32.totalorder %s3753_s8, %s3230_s1  ;;  %s3234_s22 = sshll.u32 %s3330_s30, 4  ;;  %s3235_s22 = int_to_ptr.vmem [resolvable:$false] %s3234_s22 }
 0x214   : > { %s3236_s6 = scalar_lea.vmem %s3235_s22, 4096  ;;  %p3237_p7 = scmp.lt.s32.totalorder %s3753_s8, %s3235_s22 }
 0x215   : > { %p3232_p3 = pnand %p3231_p12, %p3441_p0  ;;  %p3238_p2 = scmp.lt.s32.totalorder %s3236_s6, %s3230_s1 }
 0x217   : > { %p3233_p5 = pneg %p3232_p3  ;;  %p3239_p6 = por %p3238_p2, %p3237_p7 }
 0x219   : > { %p3240_p9 = pnand %p3239_p6, %p3233_p5 }
 0x21b   : > { %3243 = shalt.err (!%p3240_p9)
}
 0x21c   : > { %s3244_s7 = scalar_lea.hbm %s3751_s21, 2048  ;;  %s3248_s25 = scalar_lea.hbm %s3836_s4, 4096 }
 0x21d   : > { %p3245_p13 = scmp.ne.s32.totalorder %s3751_s21, %s3244_s7  ;;  %p3249_p8 = scmp.lt.s32.totalorder %s3751_s21, %s3836_s4 }
 0x21e   : > { %p3250_p4 = scmp.lt.s32.totalorder %s3248_s25, %s3244_s7 }
 0x21f   : > { %p3246_p11 = pnand %p3245_p13, %p3441_p0 }
 0x220   : > { %p3251_p10 = por %p3250_p4, %p3249_p8 }
 0x221   : > { %p3247_p1 = pneg %p3246_p11 }
 0x223   : > { %p3252_p12 = pnand %p3251_p10, %p3247_p1 }
 0x225   : > { %3255 = shalt.err (!%p3252_p12)
}
 0x226   : > { %2763 = dma.vmem_to_hbm [thread:$0]  (%p3441_p0), %s3753_s8, 2048, %s3751_s21, %s3757_s23, %s3327_s12, %s3327_s12, %s3328_s9  }
 0x227 PF: > { %s1909_s18 = sand.u32 1, %s3298_s15   ;;  %p3851_p3 = scmp.ne.s32.totalorder %s3841_s24, 0 }
 0x228   : > { %p3852_p5 = scmp.ge.s32.totalorder %s3318_s20, 2  ;;  %s1910_s27 = scalar_lea.sflag [#allocation4], %s1909_s18 }
 0x22a   : > { %p2776_p7 = pnand %p3852_p5, %p3851_p3 }
 0x22c   : > { %p2777_p2 = pneg %p2776_p7 }
 0x22e   : > { %3289 = dma.done.wait (%p2777_p2), %s1910_s27, 2048  }
 0x22f   : > { %3291 = vsyncadd (%p2777_p2), %s1910_s27, 4294965248  ;;  %s3853_s11 = sadd.s32 4294967294, %s3318_s20  }
 0x230   : > { %s1918_s14 = sand.u32 1, %s3853_s11  }
 0x231   : > { %s1919_s1 = scalar_lea.sflag [#allocation9], %s1918_s14 }
 0x232   : > { %3293 = dma.done.wait (%p2777_p2), %s1919_s1, 4096  }
 0x233   : > { %3295 = vsyncadd (%p2777_p2), %s1919_s1, 4294963200  ;;  %s25_s20 = sadd.s32 1, %s3318_s20   ;;  %s3854_s15 = smov %s3302_s16 }
 0x234   : > { %p22_p0 = scmp.ge.s32.totalorder %s25_s20, 4   ;;  %s3855_s16 = smov %s3306_s17 }
 0x235   : > { %s3856_s17 = smov %s3450_s26  ;;  %s3857_s18 = smov %s3314_s19 }
 0x236   : > { %s3858_s19 = smov %s3860_s29  ;;  %24 = sbr.rel (!%p22_p0) target bundleno = 11 (0xb), region = 112 }
 0x23b   :  { %1933 = vsyncpa [#allocation3], 1 }
 0x23c   :  { %1935 = vsyncpa [#allocation3 + $0x1], 1 }
 0x23d   :  { %1936 = vsyncpa [#allocation6], 1 }
 0x23e   :  { %1937 = vsyncpa [#allocation4], 1 }
 0x23f   :  { %1939 = vsyncpa [#allocation4 + $0x1], 1 }
 0x240   :  { %1940 = vsyncpa [#allocation9], 1 }
 0x241   :  { %1942 = vsyncpa [#allocation9 + $0x1], 1 }

</bundles_post_ra>
